<compile_context>
chip_gen: v7x
topology: tpu7x:2x2x1
jax: 0.10.0
libtpu: 0.0.40
codegen_flags: <defaults>
</compile_context>

<pallas_src>
import jax
import jax.numpy as jnp
from jax.experimental import pallas as pl
from jax.experimental.pallas import tpu as pltpu


def _round_up(v, m):
    return ((v + m - 1) // m) * m


def _mlp_kernel(x_ref,
                w1_ref, b1_ref,
                w2_ref, b2_ref,
                w3_ref, b3_ref,        # w3_ref is the transposed row [1, n/16] (f32)
                w4a_ref, w4b_ref, b4_ref,
                w5_ref, b5_ref,
                w6_ref, b6_ref,        # w6_ref is the transposed row [1, n/64] (f32)
                out_ref):
    f32 = jnp.float32
    bf16 = jnp.bfloat16

    x = x_ref[...]                                           # bf16 [TB, n]

    # envelope_extraction_layers: Linear(n -> n/4) + ReLU  (bf16 MXU, f32 acc)
    h1 = jnp.maximum(
        jnp.dot(x, w1_ref[...], preferred_element_type=f32) + b1_ref[...], 0.0)
    h1_bf = h1.astype(bf16)                                  # reused by two MXU ops

    # envelope_layer: Linear(n/4 -> n/16) + ReLU
    e1 = jnp.maximum(
        jnp.dot(h1_bf, w2_ref[...], preferred_element_type=f32) + b2_ref[...], 0.0)
    # Linear(n/16 -> 1) + ReLU as VPU multiply + lane reduce (1-lane matmul avoided).
    env = jnp.maximum(
        jnp.sum(e1 * w3_ref[...], axis=-1, keepdims=True) + b3_ref[...], 0.0)

    # higher_processing_layers on concat([h1, env], dim=1), without the concat:
    #   cat @ W4 == h1 @ W4[:n/4] + env * W4[n/4]     (env is [TB,1])
    p1 = jnp.maximum(
        jnp.dot(h1_bf, w4a_ref[...], preferred_element_type=f32)
        + env * w4b_ref[...]
        + b4_ref[...], 0.0)

    p2 = jnp.maximum(
        jnp.dot(p1.astype(bf16), w5_ref[...], preferred_element_type=f32)
        + b5_ref[...], 0.0)

    # Final Linear(n/64 -> 1) + Sigmoid, again as VPU reduce.
    logits = jnp.sum(p2 * w6_ref[...], axis=-1, keepdims=True) + b6_ref[...]
    sig = jax.nn.sigmoid(logits)                             # [TB, 1] f32

    # Pack the two 1-column results into one lane-adjacent (TB, 2) block:
    # column 0 = sigmoid output, column 1 = envelope.
    col = jax.lax.broadcasted_iota(jnp.int32, out_ref.shape, 1)
    out_ref[...] = jnp.where(col == 0, sig, env)


def enlarged_envelope_forward(x, params, *, tile_batch=1024):
    """x: [B, n_features] float32.  Returns (output [B,1], envelope [B,1])."""
    B, n = x.shape
    (w1, b1, w2, b2, w3, b3, w4, b4, w5, b5, w6, b6) = params
    n4, n16, n64 = n // 4, n // 16, n // 64

    # Batch tile: 128-aligned (MXU M-dim / (8,128) layout), capped by the batch.
    TB = _round_up(min(tile_batch, _round_up(B, 128)), 128)
    B_pad = _round_up(B, TB)
    if B_pad != B:
        x = jnp.pad(x, ((0, B_pad - B), (0, 0)))

    bf16 = jnp.bfloat16
    # MXU operands in bf16 (halves dominant HBM traffic for x; native MXU path).
    x_bf = x.astype(bf16)
    w1_bf, w2_bf, w5_bf = w1.astype(bf16), w2.astype(bf16), w5.astype(bf16)
    # Split concat-weight: first n/4 rows act on h1 (MXU, bf16), last row on env (VPU, f32).
    w4a = w4[:n4, :].astype(bf16)          # [n/4, n/16]
    w4b = w4[n4:, :]                       # [1,   n/16]  f32
    # 1-column linears as f32 rows for the VPU reduce path.
    w3r = jnp.transpose(w3)                # [1, n/16]
    w6r = jnp.transpose(w6)                # [1, n/64]

    weights = (w1_bf, b1, w2_bf, b2, w3r, b3, w4a, w4b, b4, w5_bf, b5, w6r, b6)

    grid = (pl.cdiv(B_pad, TB),)

    in_specs = [pl.BlockSpec((TB, n), lambda i: (i, 0))] + [
        # Constant block index -> weights/biases DMA'd once, resident across steps.
        pl.BlockSpec(a.shape, lambda i: (0, 0)) for a in weights
    ]
    out_spec = pl.BlockSpec((TB, 2), lambda i: (i, 0))
    out_shape = jax.ShapeDtypeStruct((B_pad, 2), jnp.float32)

    # Rough VMEM footprint: double-buffered x tile + packed out tile + resident
    # weights + f32 intermediates. Raise the scoped limit only if we overshoot
    # the 32 MiB default (keep <= 64 MiB so it is valid on v7x as well).
    est = (2 * TB * n * 2                      # x double buffer (bf16)
           + 2 * TB * 2 * 4                    # out double buffer (f32)
           + sum(int(a.size) * a.dtype.itemsize for a in weights)
           + TB * (2 * n4 + 2 * n16 + n64 + 2) * 4)
    vmem_limit = None
    if est > (32 << 20):
        vmem_limit = int(min(2 * est, 64 << 20))

    packed = pl.pallas_call(
        _mlp_kernel,
        grid=grid,
        in_specs=in_specs,
        out_specs=out_spec,
        out_shape=out_shape,
        compiler_params=pltpu.CompilerParams(
            dimension_semantics=("parallel",),      # megacore batch sharding on v7x
            vmem_limit_bytes=vmem_limit),
    )(x_bf, *weights)

    return packed[:B, 0:1], packed[:B, 1:2]


def init_params(key, n_features):
    """Deterministic parameter init with PyTorch-Linear-like shapes,
    pre-transposed to [in, out]; biases kept as [1, out] for clean broadcast."""
    n4, n16, n64 = n_features // 4, n_features // 16, n_features // 64
    dims = [(n_features, n4),   # envelope_extraction_layers Linear
            (n4, n16),          # envelope_layer Linear 1
            (n16, 1),           # envelope_layer Linear 2
            (n4 + 1, n16),      # higher_processing_layers Linear 1 (after concat)
            (n16, n64),         # higher_processing_layers Linear 2
            (n64, 1)]           # higher_processing_layers Linear 3
    params = []
    keys = jax.random.split(key, len(dims) * 2)
    for i, (fan_in, fan_out) in enumerate(dims):
        bound = 1.0 / jnp.sqrt(jnp.float32(fan_in))
        w = jax.random.uniform(keys[2 * i], (fan_in, fan_out),
                               jnp.float32, -bound, bound)
        b = jax.random.uniform(keys[2 * i + 1], (1, fan_out),
                               jnp.float32, -bound, bound)
        params += [w, b]
    return tuple(params)


def reference_forward(x, params):
    """Pure-JAX f32 reference matching the PyTorch forward (eval mode)."""
    (w1, b1, w2, b2, w3, b3, w4, b4, w5, b5, w6, b6) = params
    h1 = jax.nn.relu(x @ w1 + b1)
    e1 = jax.nn.relu(h1 @ w2 + b2)
    env = jax.nn.relu(e1 @ w3 + b3)
    cat = jnp.concatenate([h1, env], axis=1)
    p1 = jax.nn.relu(cat @ w4 + b4)
    p2 = jax.nn.relu(p1 @ w5 + b5)
    out = jax.nn.sigmoid(p2 @ w6 + b6)
    return out, env


def reference_forward_mixed(x, params):
    """Reference mirroring the kernel's mixed precision (bf16 MXU inputs, f32 acc)."""
    (w1, b1, w2, b2, w3, b3, w4, b4, w5, b5, w6, b6) = params
    bf, f32 = jnp.bfloat16, jnp.float32
    n4 = w1.shape[1]
    h1 = jax.nn.relu(
        jnp.dot(x.astype(bf), w1.astype(bf), preferred_element_type=f32) + b1)
    e1 = jax.nn.relu(
        jnp.dot(h1.astype(bf), w2.astype(bf), preferred_element_type=f32) + b2)
    env = jax.nn.relu(jnp.sum(e1 * w3.T, axis=-1, keepdims=True) + b3)
    p1 = jax.nn.relu(
        jnp.dot(h1.astype(bf), w4[:n4].astype(bf), preferred_element_type=f32)
        + env * w4[n4:] + b4)
    p2 = jax.nn.relu(
        jnp.dot(p1.astype(bf), w5.astype(bf), preferred_element_type=f32) + b5)
    out = jax.nn.sigmoid(jnp.sum(p2 * w6.T, axis=-1, keepdims=True) + b6)
    return out, env


if __name__ == "__main__":
    # Small shapes consistent with the module (n_features divisible by 64).
    # B deliberately NOT a multiple of the tile to exercise padded-tail handling.
    B, N_FEATURES = 200, 256

    key = jax.random.PRNGKey(0)
    kx, kp = jax.random.split(key)
    x = jax.random.normal(kx, (B, N_FEATURES), dtype=jnp.float32)
    params = init_params(kp, N_FEATURES)

    # NOTE: Dropout layers are identity in eval mode (no RNG needed).
    fwd = jax.jit(enlarged_envelope_forward, static_argnames=("tile_batch",))
    out, env = fwd(x, params, tile_batch=128)   # small tile -> 2 grid steps
    jax.block_until_ready((out, env))

    mix_out, mix_env = reference_forward_mixed(x, params)
    f32_out, f32_env = reference_forward(x, params)

    assert out.shape == (B, 1) and env.shape == (B, 1)
    # Tight check against the precision-matched reference.
    assert jnp.allclose(out, mix_out, atol=1e-3, rtol=1e-3)
    assert jnp.allclose(env, mix_env, atol=1e-3, rtol=1e-3)
    # Looser sanity check against the pure-f32 PyTorch-equivalent reference.
    assert jnp.allclose(out, f32_out, atol=3e-2, rtol=3e-2)
    assert jnp.allclose(env, f32_env, atol=3e-2, rtol=3e-2)

    print("KERNEL_OK")
</pallas_src>

<mosaic_0001>
module attributes {stable_mosaic.version = 11 : i64} {
  func.func @_mlp_kernel(%arg0: i32, %arg1: memref<128x256xbf16, #tpu.memory_space<vmem>>, %arg2: memref<256x64xbf16, #tpu.memory_space<vmem>>, %arg3: memref<1x64xf32, #tpu.memory_space<vmem>>, %arg4: memref<64x16xbf16, #tpu.memory_space<vmem>>, %arg5: memref<1x16xf32, #tpu.memory_space<vmem>>, %arg6: memref<1x16xf32, #tpu.memory_space<vmem>>, %arg7: memref<1x1xf32, #tpu.memory_space<vmem>>, %arg8: memref<64x16xbf16, #tpu.memory_space<vmem>>, %arg9: memref<1x16xf32, #tpu.memory_space<vmem>>, %arg10: memref<1x16xf32, #tpu.memory_space<vmem>>, %arg11: memref<16x4xbf16, #tpu.memory_space<vmem>>, %arg12: memref<1x4xf32, #tpu.memory_space<vmem>>, %arg13: memref<1x4xf32, #tpu.memory_space<vmem>>, %arg14: memref<1x1xf32, #tpu.memory_space<vmem>>, %arg15: memref<128x2xf32, #tpu.memory_space<vmem>>) attributes {dimension_semantics = [#tpu.dimension_semantics<parallel>], iteration_bounds = array<i64: 2>, scalar_prefetch = 0 : i64, scratch_operands = 0 : i64, tpu.core_type = #tpu.core_type<tc>, window_params = [{transform_indices = @transform_0, window_bounds = array<i64: 128, 256>}, {pipeline_mode = #tpu.pipeline_mode<synchronous>, transform_indices = @transform_1, window_bounds = array<i64: 256, 64>}, {pipeline_mode = #tpu.pipeline_mode<synchronous>, transform_indices = @transform_2, window_bounds = array<i64: 1, 64>}, {pipeline_mode = #tpu.pipeline_mode<synchronous>, transform_indices = @transform_3, window_bounds = array<i64: 64, 16>}, {pipeline_mode = #tpu.pipeline_mode<synchronous>, transform_indices = @transform_4, window_bounds = array<i64: 1, 16>}, {pipeline_mode = #tpu.pipeline_mode<synchronous>, transform_indices = @transform_5, window_bounds = array<i64: 1, 16>}, {pipeline_mode = #tpu.pipeline_mode<synchronous>, transform_indices = @transform_6, window_bounds = array<i64: 1, 1>}, {pipeline_mode = #tpu.pipeline_mode<synchronous>, transform_indices = @transform_7, window_bounds = array<i64: 64, 16>}, {pipeline_mode = #tpu.pipeline_mode<synchronous>, transform_indices = @transform_8, window_bounds = array<i64: 1, 16>}, {pipeline_mode = #tpu.pipeline_mode<synchronous>, transform_indices = @transform_9, window_bounds = array<i64: 1, 16>}, {pipeline_mode = #tpu.pipeline_mode<synchronous>, transform_indices = @transform_10, window_bounds = array<i64: 16, 4>}, {pipeline_mode = #tpu.pipeline_mode<synchronous>, transform_indices = @transform_11, window_bounds = array<i64: 1, 4>}, {pipeline_mode = #tpu.pipeline_mode<synchronous>, transform_indices = @transform_12, window_bounds = array<i64: 1, 4>}, {pipeline_mode = #tpu.pipeline_mode<synchronous>, transform_indices = @transform_13, window_bounds = array<i64: 1, 1>}, {transform_indices = @transform_14, window_bounds = array<i64: 128, 2>}]} {
    %c0 = arith.constant 0 : index
    %c0_0 = arith.constant 0 : index
    %0 = vector.load %arg1[%c0, %c0_0] : memref<128x256xbf16, #tpu.memory_space<vmem>>, vector<128x256xbf16>
    %c0_1 = arith.constant 0 : index
    %c0_2 = arith.constant 0 : index
    %1 = vector.load %arg2[%c0_1, %c0_2] : memref<256x64xbf16, #tpu.memory_space<vmem>>, vector<256x64xbf16>
    %cst = arith.constant dense<0.000000e+00> : vector<128x64xf32>
    %2 = tpu.matmul %0, %1, %cst {dimension_numbers = #tpu.dot_dimension_numbers<[1], [0], [0], [1], [0, 0, 1, 1], [], []>} : vector<128x256xbf16>, vector<256x64xbf16>, vector<128x64xf32> -> vector<128x64xf32>
    %c0_3 = arith.constant 0 : index
    %c0_4 = arith.constant 0 : index
    %3 = vector.load %arg3[%c0_3, %c0_4] : memref<1x64xf32, #tpu.memory_space<vmem>>, vector<1x64xf32>
    %4 = vector.broadcast %3 : vector<1x64xf32> to vector<128x64xf32>
    %5 = arith.addf %2, %4 : vector<128x64xf32>
    %cst_5 = arith.constant 0.000000e+00 : f32
    %6 = vector.broadcast %cst_5 : f32 to vector<128x64xf32>
    %7 = arith.maximumf %5, %6 : vector<128x64xf32>
    %8 = arith.truncf %7 : vector<128x64xf32> to vector<128x64xbf16>
    %c0_6 = arith.constant 0 : index
    %c0_7 = arith.constant 0 : index
    %9 = vector.load %arg4[%c0_6, %c0_7] : memref<64x16xbf16, #tpu.memory_space<vmem>>, vector<64x16xbf16>
    %cst_8 = arith.constant dense<0.000000e+00> : vector<128x16xf32>
    %10 = tpu.matmul %8, %9, %cst_8 {dimension_numbers = #tpu.dot_dimension_numbers<[1], [0], [0], [1], [0, 0, 1, 1], [], []>} : vector<128x64xbf16>, vector<64x16xbf16>, vector<128x16xf32> -> vector<128x16xf32>
    %c0_9 = arith.constant 0 : index
    %c0_10 = arith.constant 0 : index
    %11 = vector.load %arg5[%c0_9, %c0_10] : memref<1x16xf32, #tpu.memory_space<vmem>>, vector<1x16xf32>
    %12 = vector.broadcast %11 : vector<1x16xf32> to vector<128x16xf32>
    %13 = arith.addf %10, %12 : vector<128x16xf32>
    %cst_11 = arith.constant 0.000000e+00 : f32
    %14 = vector.broadcast %cst_11 : f32 to vector<128x16xf32>
    %15 = arith.maximumf %13, %14 : vector<128x16xf32>
    %c0_12 = arith.constant 0 : index
    %c0_13 = arith.constant 0 : index
    %16 = vector.load %arg6[%c0_12, %c0_13] : memref<1x16xf32, #tpu.memory_space<vmem>>, vector<1x16xf32>
    %17 = vector.broadcast %16 : vector<1x16xf32> to vector<128x16xf32>
    %18 = arith.mulf %15, %17 : vector<128x16xf32>
    %cst_14 = arith.constant dense<0.000000e+00> : vector<128xf32>
    %19 = vector.multi_reduction <add>, %18, %cst_14 [1] : vector<128x16xf32> to vector<128xf32>
    %20 = vector.shape_cast %19 : vector<128xf32> to vector<128x1xf32>
    %c0_15 = arith.constant 0 : index
    %c0_16 = arith.constant 0 : index
    %21 = vector.load %arg7[%c0_15, %c0_16] : memref<1x1xf32, #tpu.memory_space<vmem>>, vector<1x1xf32>
    %22 = vector.broadcast %21 : vector<1x1xf32> to vector<128x1xf32>
    %23 = arith.addf %20, %22 : vector<128x1xf32>
    %cst_17 = arith.constant 0.000000e+00 : f32
    %24 = vector.broadcast %cst_17 : f32 to vector<128x1xf32>
    %25 = arith.maximumf %23, %24 : vector<128x1xf32>
    %c0_18 = arith.constant 0 : index
    %c0_19 = arith.constant 0 : index
    %26 = vector.load %arg8[%c0_18, %c0_19] : memref<64x16xbf16, #tpu.memory_space<vmem>>, vector<64x16xbf16>
    %cst_20 = arith.constant dense<0.000000e+00> : vector<128x16xf32>
    %27 = tpu.matmul %8, %26, %cst_20 {dimension_numbers = #tpu.dot_dimension_numbers<[1], [0], [0], [1], [0, 0, 1, 1], [], []>} : vector<128x64xbf16>, vector<64x16xbf16>, vector<128x16xf32> -> vector<128x16xf32>
    %c0_21 = arith.constant 0 : index
    %c0_22 = arith.constant 0 : index
    %28 = vector.load %arg9[%c0_21, %c0_22] : memref<1x16xf32, #tpu.memory_space<vmem>>, vector<1x16xf32>
    %29 = vector.broadcast %25 : vector<128x1xf32> to vector<128x16xf32>
    %30 = vector.broadcast %28 : vector<1x16xf32> to vector<128x16xf32>
    %31 = arith.mulf %29, %30 : vector<128x16xf32>
    %32 = arith.addf %27, %31 : vector<128x16xf32>
    %c0_23 = arith.constant 0 : index
    %c0_24 = arith.constant 0 : index
    %33 = vector.load %arg10[%c0_23, %c0_24] : memref<1x16xf32, #tpu.memory_space<vmem>>, vector<1x16xf32>
    %34 = vector.broadcast %33 : vector<1x16xf32> to vector<128x16xf32>
    %35 = arith.addf %32, %34 : vector<128x16xf32>
    %cst_25 = arith.constant 0.000000e+00 : f32
    %36 = vector.broadcast %cst_25 : f32 to vector<128x16xf32>
    %37 = arith.maximumf %35, %36 : vector<128x16xf32>
    %38 = arith.truncf %37 : vector<128x16xf32> to vector<128x16xbf16>
    %c0_26 = arith.constant 0 : index
    %c0_27 = arith.constant 0 : index
    %39 = vector.load %arg11[%c0_26, %c0_27] : memref<16x4xbf16, #tpu.memory_space<vmem>>, vector<16x4xbf16>
    %cst_28 = arith.constant dense<0.000000e+00> : vector<128x4xf32>
    %40 = tpu.matmul %38, %39, %cst_28 {dimension_numbers = #tpu.dot_dimension_numbers<[1], [0], [0], [1], [0, 0, 1, 1], [], []>} : vector<128x16xbf16>, vector<16x4xbf16>, vector<128x4xf32> -> vector<128x4xf32>
    %c0_29 = arith.constant 0 : index
    %c0_30 = arith.constant 0 : index
    %41 = vector.load %arg12[%c0_29, %c0_30] : memref<1x4xf32, #tpu.memory_space<vmem>>, vector<1x4xf32>
    %42 = vector.broadcast %41 : vector<1x4xf32> to vector<128x4xf32>
    %43 = arith.addf %40, %42 : vector<128x4xf32>
    %cst_31 = arith.constant 0.000000e+00 : f32
    %44 = vector.broadcast %cst_31 : f32 to vector<128x4xf32>
    %45 = arith.maximumf %43, %44 : vector<128x4xf32>
    %c0_32 = arith.constant 0 : index
    %c0_33 = arith.constant 0 : index
    %46 = vector.load %arg13[%c0_32, %c0_33] : memref<1x4xf32, #tpu.memory_space<vmem>>, vector<1x4xf32>
    %47 = vector.broadcast %46 : vector<1x4xf32> to vector<128x4xf32>
    %48 = arith.mulf %45, %47 : vector<128x4xf32>
    %cst_34 = arith.constant dense<0.000000e+00> : vector<128xf32>
    %49 = vector.multi_reduction <add>, %48, %cst_34 [1] : vector<128x4xf32> to vector<128xf32>
    %50 = vector.shape_cast %49 : vector<128xf32> to vector<128x1xf32>
    %c0_35 = arith.constant 0 : index
    %c0_36 = arith.constant 0 : index
    %51 = vector.load %arg14[%c0_35, %c0_36] : memref<1x1xf32, #tpu.memory_space<vmem>>, vector<1x1xf32>
    %52 = vector.broadcast %51 : vector<1x1xf32> to vector<128x1xf32>
    %53 = arith.addf %50, %52 : vector<128x1xf32>
    %54 = arith.negf %53 : vector<128x1xf32>
    %55 = math.exp %54 : vector<128x1xf32>
    %cst_37 = arith.constant 1.000000e+00 : f32
    %56 = vector.broadcast %cst_37 : f32 to vector<128x1xf32>
    %57 = arith.addf %56, %55 : vector<128x1xf32>
    %58 = arith.divf %56, %57 : vector<128x1xf32>
    %59 = tpu.iota {dimensions = array<i32: 1>} : vector<128x2xi32>
    %c0_i32 = arith.constant 0 : i32
    %60 = vector.broadcast %c0_i32 : i32 to vector<128x2xi32>
    %61 = arith.cmpi eq, %59, %60 : vector<128x2xi32>
    %62 = vector.shape_cast %58 : vector<128x1xf32> to vector<128x1xf32>
    %63 = vector.broadcast %62 : vector<128x1xf32> to vector<128x2xf32>
    %64 = vector.shape_cast %25 : vector<128x1xf32> to vector<128x1xf32>
    %65 = vector.broadcast %64 : vector<128x1xf32> to vector<128x2xf32>
    %66 = arith.select %61, %63, %65 : vector<128x2xi1>, vector<128x2xf32>
    %c0_38 = arith.constant 0 : index
    %c0_39 = arith.constant 0 : index
    %67 = vector.load %arg15[%c0_38, %c0_39] : memref<128x2xf32, #tpu.memory_space<vmem>>, vector<128x2xf32>
    tpu.vector_store %arg15[%c0_38, %c0_39], %66 {strides = array<i32>} : memref<128x2xf32, #tpu.memory_space<vmem>>, vector<128x2xf32>,
    return
  }
  func.func @transform_0(%arg0: i32) -> (i32, i32) {
    %c0_i32 = arith.constant 0 : i32
    %c0_i32_0 = arith.constant 0 : i32
    return %arg0, %c0_i32 : i32, i32
  }
  func.func @transform_1(%arg0: i32) -> (i32, i32) {
    %c0_i32 = arith.constant 0 : i32
    %c0_i32_0 = arith.constant 0 : i32
    %c0_i32_1 = arith.constant 0 : i32
    return %c0_i32, %c0_i32_0 : i32, i32
  }
  func.func @transform_2(%arg0: i32) -> (i32, i32) {
    %c0_i32 = arith.constant 0 : i32
    %c0_i32_0 = arith.constant 0 : i32
    %c0_i32_1 = arith.constant 0 : i32
    return %c0_i32, %c0_i32_0 : i32, i32
  }
  func.func @transform_3(%arg0: i32) -> (i32, i32) {
    %c0_i32 = arith.constant 0 : i32
    %c0_i32_0 = arith.constant 0 : i32
    %c0_i32_1 = arith.constant 0 : i32
    return %c0_i32, %c0_i32_0 : i32, i32
  }
  func.func @transform_4(%arg0: i32) -> (i32, i32) {
    %c0_i32 = arith.constant 0 : i32
    %c0_i32_0 = arith.constant 0 : i32
    %c0_i32_1 = arith.constant 0 : i32
    return %c0_i32, %c0_i32_0 : i32, i32
  }
  func.func @transform_5(%arg0: i32) -> (i32, i32) {
    %c0_i32 = arith.constant 0 : i32
    %c0_i32_0 = arith.constant 0 : i32
    %c0_i32_1 = arith.constant 0 : i32
    return %c0_i32, %c0_i32_0 : i32, i32
  }
  func.func @transform_6(%arg0: i32) -> (i32, i32) {
    %c0_i32 = arith.constant 0 : i32
    %c0_i32_0 = arith.constant 0 : i32
    %c0_i32_1 = arith.constant 0 : i32
    return %c0_i32, %c0_i32_0 : i32, i32
  }
  func.func @transform_7(%arg0: i32) -> (i32, i32) {
    %c0_i32 = arith.constant 0 : i32
    %c0_i32_0 = arith.constant 0 : i32
    %c0_i32_1 = arith.constant 0 : i32
    return %c0_i32, %c0_i32_0 : i32, i32
  }
  func.func @transform_8(%arg0: i32) -> (i32, i32) {
    %c0_i32 = arith.constant 0 : i32
    %c0_i32_0 = arith.constant 0 : i32
    %c0_i32_1 = arith.constant 0 : i32
    return %c0_i32, %c0_i32_0 : i32, i32
  }
  func.func @transform_9(%arg0: i32) -> (i32, i32) {
    %c0_i32 = arith.constant 0 : i32
    %c0_i32_0 = arith.constant 0 : i32
    %c0_i32_1 = arith.constant 0 : i32
    return %c0_i32, %c0_i32_0 : i32, i32
  }
  func.func @transform_10(%arg0: i32) -> (i32, i32) {
    %c0_i32 = arith.constant 0 : i32
    %c0_i32_0 = arith.constant 0 : i32
    %c0_i32_1 = arith.constant 0 : i32
    return %c0_i32, %c0_i32_0 : i32, i32
  }
  func.func @transform_11(%arg0: i32) -> (i32, i32) {
    %c0_i32 = arith.constant 0 : i32
    %c0_i32_0 = arith.constant 0 : i32
    %c0_i32_1 = arith.constant 0 : i32
    return %c0_i32, %c0_i32_0 : i32, i32
  }
  func.func @transform_12(%arg0: i32) -> (i32, i32) {
    %c0_i32 = arith.constant 0 : i32
    %c0_i32_0 = arith.constant 0 : i32
    %c0_i32_1 = arith.constant 0 : i32
    return %c0_i32, %c0_i32_0 : i32, i32
  }
  func.func @transform_13(%arg0: i32) -> (i32, i32) {
    %c0_i32 = arith.constant 0 : i32
    %c0_i32_0 = arith.constant 0 : i32
    %c0_i32_1 = arith.constant 0 : i32
    return %c0_i32, %c0_i32_0 : i32, i32
  }
  func.func @transform_14(%arg0: i32) -> (i32, i32) {
    %c0_i32 = arith.constant 0 : i32
    %c0_i32_0 = arith.constant 0 : i32
    return %arg0, %c0_i32 : i32, i32
  }
}

</mosaic_0001>

<bundles_post_ra>
// kernel: enlarged_envelope_forward.1
= control target key start
LH: loop header
LB: loop body
LE: loop exit
PB: predicated region body
PF: predicated region fallthrough
CT: control target
= control target key end

     0   :  { %s2401_s17 = smov 0   ;;  %s2931_s0 = inlined_call_operand.vmem [shape: bf16[256,256], index: 0, kind: input, shape index: {}]   ;;  %s2932_s1 = inlined_call_operand.vmem [shape: bf16[256,64], index: 1, kind: input, shape index: {}]   ;;  %s2933_s2 = inlined_call_operand.vmem [shape: f32[1,64], index: 2, kind: input, shape index: {}]   ;;  %s2934_s3 = inlined_call_operand.vmem [shape: bf16[64,16], index: 3, kind: input, shape index: {}]   ;;  %s2935_s4 = inlined_call_operand.vmem [shape: f32[1,16], index: 4, kind: input, shape index: {}]   ;;  %s2936_s5 = inlined_call_operand.vmem [shape: f32[1,16], index: 5, kind: input, shape index: {}]   ;;  %s2937_s6 = inlined_call_operand.<no memory space> [shape: f32[1,1], index: 6, kind: input, shape index: {}]   ;;  %s2938_s7 = inlined_call_operand.vmem [shape: bf16[64,16], index: 7, kind: input, shape index: {}]   ;;  %s2939_s8 = inlined_call_operand.vmem [shape: f32[1,16], index: 8, kind: input, shape index: {}]   ;;  %s2940_s9 = inlined_call_operand.vmem [shape: f32[1,16], index: 9, kind: input, shape index: {}]   ;;  %s2941_s10 = inlined_call_operand.vmem [shape: bf16[16,4], index: 10, kind: input, shape index: {}]   ;;  %s2942_s11 = inlined_call_operand.vmem [shape: f32[1,4], index: 11, kind: input, shape index: {}]   ;;  %s2943_s12 = inlined_call_operand.vmem [shape: f32[1,4], index: 12, kind: input, shape index: {}]   ;;  %s2944_s14 = inlined_call_operand.vmem [shape: f32[256,2], index: 14, kind: output, shape index: {}]   ;;  %s2945_s13 = inlined_call_operand.<no memory space> [shape: f32[1,1], index: 13, kind: input, shape index: {}]  }
   0x1   :  { %v19_v0 = vstv %s2937_s6  ;;  %v21_v1 = vstv %s2945_s13 }
   0x2   :  { %20 = vst [vmem:[#allocation2] sm:$0x1] %v19_v0  ;;  %22 = vst [vmem:[#allocation3] sm:$0x1] %v21_v1 }
   0x3 LB: > { %s1913_s18 = sadd.s32 4294967295, %s2317_s17   ;;  %p1917_p0 = scmp.ge.s32.totalorder %s2317_s17, 1  ;;  %s2317_s17 = sphi %s2401_s17, %s28_s17  }
   0x4   : > { %p418_p1 = scmp.lt.s32.totalorder %s2317_s17, 3 }
   0x6   : > { %p419_p2 = pnand %p1917_p0, %p418_p1 }
   0x7   : > { %v2198_v2 = vld [vmem:[%s2932_s1 + $0x40] sm:$0xff] (!%p419_p2)   ;;  %s1918_s13 = sshll.u32 (!%p419_p2), %s1913_s18, 4  ;;  %v2200_v4 = vld [vmem:[%s2932_s1 + $0x48] sm:$0xff] (!%p419_p2)   ;;  %v2202_v6 = vld [vmem:[%s2932_s1 + $0x50] sm:$0xff] (!%p419_p2)   ;;  %vm870_vm0 = vcmask (!%p419_p2), 523264   ;;  %vm1031_vm1 = vcmask (!%p419_p2), 130048  }
   0x8   : > { %422 = sbr.rel (%p419_p2) target bundleno = 1355 (0x54b), region = 76  ;;  %v2199_v3 = vld [vmem:[%s2932_s1] sm:$0xff] (!%p419_p2)   ;;  %2016 = vmatprep.subr.bf16.mxu0 (!%p419_p2), %v2198_v2  ;;  %v2201_v5 = vld [vmem:[%s2932_s1 + $0x8] sm:$0xff] (!%p419_p2)   ;;  %p466_p3 = scmp.lt.s32.totalorder (!%p419_p2), %s1918_s13, 31  ;;  %v2203_v7 = vld [vmem:[%s2932_s1 + $0x10] sm:$0xff] (!%p419_p2)   ;;  %vm1573_vm2 = vcmask (!%p419_p2), 31744  }
   0x9   : > { %2017 = vmatpush3.bf16.msra.mxu0 (!%p419_p2), %v2199_v3  ;;  %v2204_v8 = vld [vmem:[%s2932_s1 + $0x58] sm:$0xff] (!%p419_p2)   ;;  %v2206_v10 = vld [vmem:[%s2932_s1 + $0x60] sm:$0xff] (!%p419_p2)   ;;  %v2208_v12 = vld [vmem:[%s2932_s1 + $0x68] sm:$0xff] (!%p419_p2)   ;;  %vm1840_vm4 = vcmask (!%p419_p2), 15360  }
   0xa   : > { %2018 = vmatprep.subr.bf16.mxu0 (!%p419_p2), %v2200_v4  ;;  %v2205_v9 = vld [vmem:[%s2932_s1 + $0x18] sm:$0xff] (!%p419_p2)   ;;  %v2207_v11 = vld [vmem:[%s2932_s1 + $0x20] sm:$0xff] (!%p419_p2)   ;;  %v2209_v14 = vld [vmem:[%s2932_s1 + $0x28] sm:$0xff] (!%p419_p2)  }
   0xb   : > { %v2210_v15 = vld [vmem:[%s2932_s1 + $0x70] sm:$0xff] (!%p419_p2)   ;;  %v2212_v17 = vld [vmem:[%s2932_s1 + $0x78] sm:$0xff] (!%p419_p2)   ;;  %v2238_v19 = vld [vmem:[%s2934_s3] sm:$0xff] (!%p419_p2)  }
   0xc   : > { %v2211_v16 = vld [vmem:[%s2932_s1 + $0x30] sm:$0xff] (!%p419_p2)   ;;  %v2213_v18 = vld [vmem:[%s2932_s1 + $0x38] sm:$0xff] (!%p419_p2)   ;;  %v2239_v21 = vld [vmem:[%s2934_s3 + $0x8] sm:$0xff] (!%p419_p2)   ;;  %2179 = vmatprep.subr.bf16.mxu1 (!%p419_p2), %v2238_v19 }
   0xd   : > { %2019 = vmatpush3.bf16.msra.mxu0 (!%p419_p2), %v2201_v5  ;;  %2183 = vmatpush3.bf16.msra.mxu1 (!%p419_p2), %v2238_v19  ;;  %v2240_v36 = vld [vmem:[%s2934_s3 + $0x10] sm:$0xff] (!%p419_p2)   ;;  %v2241_v37 = vld [vmem:[%s2934_s3 + $0x18] sm:$0xff] (!%p419_p2)   ;;  %v2242_v38 = vld [vmem:[%s2938_s7] sm:$0xff] (!%p419_p2)  }
   0xe   : > { %2020 = vmatprep.subr.bf16.mxu0 (!%p419_p2), %v2202_v6  ;;  %2180 = vmatprep.subr.bf16.mxu1 (!%p419_p2), %v2239_v21  ;;  %v2501_v40 = vld [vmem:[%s2933_s2] ss:$0 sm:$0xff] (!%p419_p2) }
   0xf   : > { %s2947_s13 = smov (!%p466_p3, %s1918_s13), 31 }
  0x10   : > { %s2015_s6 = sshll.u32 %s2947_s13, 3 }
  0x11   : > { %2021 = vmatpush3.bf16.msra.mxu0 %v2203_v7  ;;  %s2444_s23 = scalar_lea.vmem %s2931_s0, %s2015_s6  ;;  %2184 = vmatpush3.bf16.msra.mxu1 %v2239_v21  ;;  %s2862_s28 = scalar_lea.vmem %s2944_s14, %s2015_s6 }
  0x12   : > { %2022 = vmatprep.subr.bf16.mxu0 %v2204_v8  ;;  %v2216_v13 = vld [vmem:[%s2444_s23 + $0x4] ss:$8 sps:$4 sm:$0xff]   ;;  %v2214_v20 = vld [vmem:[%s2444_s23] ss:$8 sps:$4 sm:$0xff]   ;;  %v2217_v22 = vld [vmem:[%s2444_s23 + $0x14] ss:$8 sps:$4 sm:$0xff]   ;;  %2181 = vmatprep.subr.bf16.mxu1 %v2240_v36 }
  0x13   : > { %742 = vmatprep.mubr.bf16.mxu0 %v2216_v13  ;;  %v2219_v23 = vld [vmem:[%s2444_s23 + $0x10] ss:$8 sps:$4 sm:$0xff]   ;;  %v2220_v24 = vld [vmem:[%s2444_s23 + $0x24] ss:$8 sps:$4 sm:$0xff]   ;;  %v2222_v25 = vld [vmem:[%s2444_s23 + $0x20] ss:$8 sps:$4 sm:$0xff]  }
  0x14   : > { %v2223_v26 = vld [vmem:[%s2444_s23 + $0x34] ss:$8 sps:$4 sm:$0xff]   ;;  %v2225_v27 = vld [vmem:[%s2444_s23 + $0x30] ss:$8 sps:$4 sm:$0xff]   ;;  %v2226_v28 = vld [vmem:[%s2444_s23 + $0x44] ss:$8 sps:$4 sm:$0xff]  }
  0x15   : > { %2023 = vmatpush3.bf16.msra.mxu0 %v2205_v9  ;;  %v2228_v29 = vld [vmem:[%s2444_s23 + $0x40] ss:$8 sps:$4 sm:$0xff]   ;;  %v2229_v30 = vld [vmem:[%s2444_s23 + $0x54] ss:$8 sps:$4 sm:$0xff]   ;;  %v2231_v31 = vld [vmem:[%s2444_s23 + $0x50] ss:$8 sps:$4 sm:$0xff]   ;;  %2185 = vmatpush3.bf16.msra.mxu1 %v2240_v36 }
  0x16   : > { %2024 = vmatprep.subr.bf16.mxu0 %v2206_v10  ;;  %v2232_v32 = vld [vmem:[%s2444_s23 + $0x64] ss:$8 sps:$4 sm:$0xff]   ;;  %v2234_v33 = vld [vmem:[%s2444_s23 + $0x60] ss:$8 sps:$4 sm:$0xff]   ;;  %v2235_v34 = vld [vmem:[%s2444_s23 + $0x74] ss:$8 sps:$4 sm:$0xff]   ;;  %2182 = vmatprep.subr.bf16.mxu1 %v2241_v37 }
  0x17   : > { %v2237_v35 = vld [vmem:[%s2444_s23 + $0x70] ss:$8 sps:$4 sm:$0xff]  }
  0x19   : > { %2025 = vmatpush3.bf16.msra.mxu0 %v2207_v11  ;;  %2186 = vmatpush3.bf16.msra.mxu1 %v2241_v37 }
  0x1a   : > { %2026 = vmatprep.subr.bf16.mxu0 %v2208_v12  ;;  %2137 = vmatprep.subr.bf16.mxu1 %v2242_v38 }
  0x1d   : > { %2027 = vmatpush3.bf16.msra.mxu0 %v2209_v14 }
  0x1e   : > { %2028 = vmatprep.subr.bf16.mxu0 %v2210_v15 }
  0x21   : > { %2029 = vmatpush3.bf16.msra.mxu0 %v2211_v16 }
  0x22   : > { %2030 = vmatprep.subr.bf16.mxu0 %v2212_v17 }
  0x25   : > { %2031 = vmatpush3.bf16.msra.mxu0 %v2213_v18 }
  0x26   : > { %2113 = vmatprep.subr.bf16.mxu0 %v2238_v19 }
  0x28   : > { %743 = vmatmul.mubr.bf16.vlgmr.msra.gmra.mrb[0].mxu0 %v2214_v20 }
  0x29   : > { %750 = vmatprep.mubr.bf16.mxu0 %v2217_v22  ;;  %2114 = vmatpush3.bf16.msra.mxu0 %v2238_v19 }
  0x2a   : > { %2115 = vmatprep.subr.bf16.mxu0 %v2239_v21 }
  0x2d   : > { %2116 = vmatpush3.bf16.msra.mxu0 %v2239_v21 }
  0x2e   : > { %2117 = vmatprep.subr.bf16.mxu0 %v2240_v36 }
  0x30   : > { %751 = vmatmul.mubr.bf16.gmra.mrb[4].mxu0 %v2219_v23 }
  0x31   : > { %758 = vmatprep.mubr.bf16.mxu0 %v2220_v24  ;;  %2118 = vmatpush3.bf16.msra.mxu0 %v2240_v36  ;;  %v2243_v24 = vld [vmem:[%s2938_s7 + $0x8] sm:$0xff]  }
  0x32   : > { %2119 = vmatprep.subr.bf16.mxu0 %v2241_v37 }
  0x35   : > { %2120 = vmatpush3.bf16.msra.mxu0 %v2241_v37  ;;  %v2245_v37 = vld [vmem:[%s2938_s7 + $0x18] sm:$0xff]  }
  0x38   : > { %759 = vmatmul.mubr.bf16.gmra.mrb[8].mxu0 %v2222_v25 }
  0x39   : > { %766 = vmatprep.mubr.bf16.mxu0 %v2223_v26 }
  0x40   : > { %767 = vmatmul.mubr.bf16.gmra.mrb[12].mxu0 %v2225_v27 }
  0x41   : > { %774 = vmatprep.mubr.bf16.mxu0 %v2226_v28 }
  0x48   : > { %775 = vmatmul.mubr.bf16.gmra.mrb[16].mxu0 %v2228_v29  ;;  %v2244_v29 = vld [vmem:[%s2938_s7 + $0x10] sm:$0xff]  }
  0x49   : > { %782 = vmatprep.mubr.bf16.mxu0 %v2229_v30 }
  0x50   : > { %783 = vmatmul.mubr.bf16.gmra.mrb[20].mxu0 %v2231_v31 }
  0x51   : > { %790 = vmatprep.mubr.bf16.mxu0 %v2232_v32 }
  0x58   : > { %791 = vmatmul.mubr.bf16.gmra.mrb[24].mxu0 %v2234_v33 }
  0x59   : > { %798 = vmatprep.mubr.bf16.mxu0 %v2235_v34 }
  0x60   : > { %799 = vmatmul.mubr.bf16.gmra.mrb[28].mxu0 %v2237_v35 }
  0xfb   : > { %v2032_v39 = vpop.f32.mrb[0].mxu0 }
  0xfc   : > { %v2033_v41 = vpop.f32.mrb[1].mxu0 }
  0xfd   : > { %v2034_v42 = vadd.f32 %v2033_v41, %v2032_v39  ;;  %v2035_v43 = vpop.f32.mrb[2].mxu0 }
  0xfe   : > { %v2036_v44 = vpop.f32.mrb[3].mxu0 }
  0xff   : > { %v745_v45 = vadd.f32 %v2034_v42, %v2501_v40  ;;  %v2037_v46 = vadd.f32 %v2036_v44, %v2035_v43 }
 0x101   : > { %v748_v47 = vadd.f32 %v2037_v46, %v2501_v40  ;;  %v807_v48 = vmax.f32 %v745_v45, 0.0 }
 0x103   : > { %v808_v49 = vmax.f32 %v748_v47, 0.0  ;;  %v2038_v50 = vpop.f32.mrb[4].mxu0 }
 0x104   : > { %v2039_v51 = vpop.f32.mrb[5].mxu0 }
 0x105   : > { %v2505_v52 = vpack.c.bf16 %v808_v49, %v807_v48  ;;  %v2040_v53 = vadd.f32 %v2039_v51, %v2038_v50  ;;  %v2041_v54 = vpop.f32.mrb[6].mxu0 }
 0x106   : > { %v2042_v55 = vpop.f32.mrb[7].mxu0 }
 0x107   : > { %v753_v56 = vadd.f32 %v2040_v53, %v2501_v40  ;;  %v2043_v57 = vadd.f32 %v2042_v55, %v2041_v54  ;;  %2121 = vmatprep.mubr.msk.bf16.mxu0 %vm870_vm0, %v2505_v52 }
 0x109   : > { %v756_v58 = vadd.f32 %v2043_v57, %v2501_v40  ;;  %v809_v59 = vmax.f32 %v753_v56, 0.0 }
 0x10b   : > { %v810_v60 = vmax.f32 %v756_v58, 0.0  ;;  %v2044_v61 = vpop.f32.mrb[8].mxu0 }
 0x10c   : > { %v2045_v62 = vpop.f32.mrb[9].mxu0 }
 0x10d   : > { %v2511_v63 = vpack.c.bf16 %v810_v60, %v809_v59  ;;  %v2046_v0 = vadd.f32 %v2045_v62, %v2044_v61  ;;  %v2047_v1 = vpop.f32.mrb[10].mxu0 }
 0x10e   : > { %v2048_v2 = vpop.f32.mrb[11].mxu0 }
 0x10f   : > { %v761_v3 = vadd.f32 %v2046_v0, %v2501_v40  ;;  %v2049_v4 = vadd.f32 %v2048_v2, %v2047_v1  ;;  %2122 = vmatmul.mubr.msk.bf16.vlgmr.msra.gmra.mrb[32].mxu0 %vm870_vm0, %v2511_v63 }
 0x111   : > { %v764_v5 = vadd.f32 %v2049_v4, %v2501_v40  ;;  %v811_v6 = vmax.f32 %v761_v3, 0.0 }
 0x113   : > { %v812_v7 = vmax.f32 %v764_v5, 0.0  ;;  %v2050_v8 = vpop.f32.mrb[12].mxu0 }
 0x114   : > { %v2051_v9 = vpop.f32.mrb[13].mxu0 }
 0x115   : > { %v2052_v10 = vadd.f32 %v2051_v9, %v2050_v8  ;;  %v2053_v11 = vpop.f32.mrb[14].mxu0  ;;  %v2517_v12 = vpack.c.bf16 %v812_v7, %v811_v6  ;;  %v2566_v9 = vld [vmem:[%s2936_s5] ss:$0 sm:$0xff] }
 0x116   : > { %v2054_v13 = vpop.f32.mrb[15].mxu0 }
 0x117   : > { %v769_v14 = vadd.f32 %v2052_v10, %v2501_v40  ;;  %v2055_v15 = vadd.f32 %v2054_v13, %v2053_v11  ;;  %2125 = vmatprep.mubr.msk.bf16.mxu1 %vm870_vm0, %v2517_v12 }
 0x119   : > { %v772_v16 = vadd.f32 %v2055_v15, %v2501_v40  ;;  %v813_v17 = vmax.f32 %v769_v14, 0.0 }
 0x11b   : > { %v814_v18 = vmax.f32 %v772_v16, 0.0  ;;  %v2056_v19 = vpop.f32.mrb[16].mxu0 }
 0x11c   : > { %v2057_v20 = vpop.f32.mrb[17].mxu0 }
 0x11d   : > { %v826_v21 = vpack.c.bf16 %v814_v18, %v813_v17  ;;  %v2058_v22 = vadd.f32 %v2057_v20, %v2056_v19  ;;  %v2059_v23 = vpop.f32.mrb[18].mxu0 }
 0x11e   : > { %v2060_v25 = vpop.f32.mrb[19].mxu0 }
 0x11f   : > { %v777_v26 = vadd.f32 %v2058_v22, %v2501_v40  ;;  %v2061_v27 = vadd.f32 %v2060_v25, %v2059_v23  ;;  %2126 = vmatmul.mubr.msk.bf16.vlgmr.msra.gmra.mrb[0].mxu1 %vm870_vm0, %v826_v21 }
 0x120   : > { %2138 = vmatpush3.bf16.msra.mxu1 %v2242_v38 }
 0x121   : > { %v780_v28 = vadd.f32 %v2061_v27, %v2501_v40  ;;  %2139 = vmatprep.subr.bf16.mxu1 %v2243_v24  ;;  %v815_v30 = vmax.f32 %v777_v26, 0.0 }
 0x123   : > { %v816_v31 = vmax.f32 %v780_v28, 0.0  ;;  %v2062_v32 = vpop.f32.mrb[20].mxu0 }
 0x124   : > { %v2063_v33 = vpop.f32.mrb[21].mxu0  ;;  %2140 = vmatpush3.bf16.msra.mxu1 %v2243_v24 }
 0x125   : > { %v827_v34 = vpack.c.bf16 %v816_v31, %v815_v30  ;;  %v2064_v35 = vadd.f32 %v2063_v33, %v2062_v32  ;;  %v2065_v36 = vpop.f32.mrb[22].mxu0  ;;  %2141 = vmatprep.subr.bf16.mxu1 %v2244_v29 }
 0x126   : > { %v2066_v38 = vpop.f32.mrb[23].mxu0 }
 0x127   : > { %v785_v39 = vadd.f32 %v2064_v35, %v2501_v40  ;;  %v2067_v41 = vadd.f32 %v2066_v38, %v2065_v36  ;;  %2129 = vmatprep.mubr.msk.bf16.mxu1 %vm870_vm0, %v827_v34 }
 0x128   : > { %2142 = vmatpush3.bf16.msra.mxu1 %v2244_v29 }
 0x129   : > { %v788_v42 = vadd.f32 %v2067_v41, %v2501_v40  ;;  %2143 = vmatprep.subr.bf16.mxu1 %v2245_v37  ;;  %v817_v43 = vmax.f32 %v785_v39, 0.0 }
 0x12b   : > { %v818_v44 = vmax.f32 %v788_v42, 0.0  ;;  %v2068_v45 = vpop.f32.mrb[24].mxu0  ;;  %v2319_v42 = vmov 0  }
 0x12c   : > { %v2069_v46 = vpop.f32.mrb[25].mxu0  ;;  %2144 = vmatpush3.bf16.msra.mxu1 %v2245_v37  ;;  %2197 = vset.pattern.permute.xlu1 %v2319_v42 }
 0x12d   : > { %v828_v47 = vpack.c.bf16 %v818_v44, %v817_v43  ;;  %v2070_v48 = vadd.f32 %v2069_v46, %v2068_v45  ;;  %v2071_v49 = vpop.f32.mrb[26].mxu0  ;;  %2196 = vset.pattern.permute.xlu0 %v2319_v42 }
 0x12e   : > { %v2072_v50 = vpop.f32.mrb[27].mxu0 }
 0x12f   : > { %v793_v51 = vadd.f32 %v2070_v48, %v2501_v40  ;;  %v2073_v53 = vadd.f32 %v2072_v50, %v2071_v49  ;;  %2130 = vmatmul.mubr.msk.bf16.gmra.mrb[4].mxu1 %vm870_vm0, %v828_v47 }
 0x131   : > { %v796_v54 = vadd.f32 %v2073_v53, %v2501_v40  ;;  %v819_v55 = vmax.f32 %v793_v51, 0.0 }
 0x133   : > { %v820_v56 = vmax.f32 %v796_v54, 0.0  ;;  %v2074_v57 = vpop.f32.mrb[28].mxu0 }
 0x134   : > { %v2075_v58 = vpop.f32.mrb[29].mxu0 }
 0x135   : > { %v829_v59 = vpack.c.bf16 %v820_v56, %v819_v55  ;;  %v2076_v60 = vadd.f32 %v2075_v58, %v2074_v57  ;;  %v2077_v61 = vpop.f32.mrb[30].mxu0 }
 0x136   : > { %v2078_v62 = vpop.f32.mrb[31].mxu0 }
 0x137   : > { %v801_v0 = vadd.f32 %v2076_v60, %v2501_v40  ;;  %v2079_v1 = vadd.f32 %v2078_v62, %v2077_v61  ;;  %2133 = vmatprep.mubr.msk.bf16.mxu1 %vm870_vm0, %v829_v59 }
 0x139   : > { %v804_v2 = vadd.f32 %v2079_v1, %v2501_v40  ;;  %v821_v3 = vmax.f32 %v801_v0, 0.0  ;;  %v2559_v40 = vld [vmem:[%s2935_s4] ss:$0 sm:$0xff] }
 0x13b   : > { %v822_v4 = vmax.f32 %v804_v2, 0.0 }
 0x13d   : > { %v830_v5 = vpack.c.bf16 %v822_v4, %v821_v3 }
 0x13f   : > { %2134 = vmatmul.mubr.msk.bf16.gmra.mrb[8].mxu1 %vm870_vm0, %v830_v5 }
 0x140   : > { %2145 = vmatprep.mubr.msk.bf16.mxu1 %vm870_vm0, %v2505_v52 }
 0x147   : > { %2146 = vmatmul.mubr.msk.bf16.vlgmr.msra.gmra.mrb[12].mxu1 %vm870_vm0, %v2511_v63 }
 0x148   : > { %2149 = vmatprep.mubr.msk.bf16.mxu1 %vm870_vm0, %v2517_v12 }
 0x14f   : > { %2150 = vmatmul.mubr.msk.bf16.gmra.mrb[16].mxu1 %vm870_vm0, %v826_v21 }
 0x150   : > { %2153 = vmatprep.mubr.msk.bf16.mxu1 %vm870_vm0, %v827_v34 }
 0x157   : > { %2154 = vmatmul.mubr.msk.bf16.gmra.mrb[20].mxu1 %vm870_vm0, %v828_v47 }
 0x158   : > { %2157 = vmatprep.mubr.msk.bf16.mxu1 %vm870_vm0, %v829_v59 }
 0x15f   : > { %2158 = vmatmul.mubr.msk.bf16.gmra.mrb[24].mxu1 %vm870_vm0, %v830_v5 }
 0x1e2   : > { %v2123_v52 = vpop.f32.mrb[32].mxu0 }
 0x1e3   : > { %v938_v63 = vadd.f32 %v2123_v52, %v2559_v40  ;;  %v929_v6 = vpop.f32.mrb[33].mxu0 }
 0x1e4   : > { %v930_v7 = vadd.f32 %v2559_v40, %v929_v6  ;;  %v2124_v8 = vpop.f32.mrb[34].mxu0 }
 0x1e5   : > { %v994_v10 = vmax.f32 %v938_v63, 0.0  ;;  %v941_v11 = vadd.f32 %v2124_v8, %v2559_v40  ;;  %v932_v12 = vpop.f32.mrb[35].mxu0 }
 0x1e6   : > { %v992_v13 = vmax.f32 %v930_v7, 0.0  ;;  %v933_v14 = vadd.f32 %v2559_v40, %v932_v12 }
 0x1e7   : > { %v995_v15 = vmax.f32 %v941_v11, 0.0  ;;  %v1017_v16 = vmul.f32 %v2566_v9, %v994_v10 }
 0x1e8   : > { %v993_v17 = vmax.f32 %v933_v14, 0.0  ;;  %v1015_v18 = vmul.f32 %v2566_v9, %v992_v13 }
 0x1e9   : > { %v1038_v19 = vsel %vm1031_vm1, %v1017_v16, 0.0  ;;  %v1018_v20 = vmul.f32 %v2566_v9, %v995_v15 }
 0x1ea   : > { %1039 = vadd.xlane.f32.xlu1 %v1038_v19  ;;  %v1032_v21 = vsel %vm1031_vm1, %v1015_v18, 0.0  ;;  %v1016_v22 = vmul.f32 %v2566_v9, %v993_v17 }
 0x1eb   : > { %1033 = vadd.xlane.f32.xlu0 %v1032_v21  ;;  %v1041_v23 = vsel %vm1031_vm1, %v1018_v20, 0.0 }
 0x1ec   : > { %v1035_v24 = vsel %vm1031_vm1, %v1016_v22, 0.0 }
 0x1ee   : > { %1042 = vadd.xlane.f32.xlu1 %v1041_v23 }
 0x1ef   : > { %1036 = vadd.xlane.f32.xlu0 %v1035_v24 }
 0x1f2   : > { %v2127_v25 = vpop.f32.mrb[0].mxu1 }
 0x1f3   : > { %v954_v26 = vadd.f32 %v2127_v25, %v2559_v40  ;;  %v945_v27 = vpop.f32.mrb[1].mxu1 }
 0x1f4   : > { %v946_v28 = vadd.f32 %v2559_v40, %v945_v27  ;;  %v2128_v29 = vpop.f32.mrb[2].mxu1 }
 0x1f5   : > { %v957_v30 = vadd.f32 %v2128_v29, %v2559_v40  ;;  %v948_v31 = vpop.f32.mrb[3].mxu1  ;;  %v998_v32 = vmax.f32 %v954_v26, 0.0 }
 0x1f6   : > { %v996_v33 = vmax.f32 %v946_v28, 0.0  ;;  %v949_v34 = vadd.f32 %v2559_v40, %v948_v31 }
 0x1f7   : > { %v999_v35 = vmax.f32 %v957_v30, 0.0  ;;  %v1021_v41 = vmul.f32 %v2566_v9, %v998_v32 }
 0x1f8   : > { %v997_v36 = vmax.f32 %v949_v34, 0.0  ;;  %v1019_v37 = vmul.f32 %v2566_v9, %v996_v33 }
 0x1f9   : > { %v1022_v44 = vmul.f32 %v2566_v9, %v999_v35  ;;  %v1050_v45 = vsel %vm1031_vm1, %v1021_v41, 0.0 }
 0x1fa   : > { %v1044_v38 = vsel %vm1031_vm1, %v1019_v37, 0.0  ;;  %v1020_v39 = vmul.f32 %v2566_v9, %v997_v36 }
 0x1fb   : > { %1045 = vadd.xlane.f32.xlu0 %v1044_v38  ;;  %v1053_v46 = vsel %vm1031_vm1, %v1022_v44, 0.0  ;;  %v2646_v38 = vld [vmem:[#allocation2] ss:$0 sm:$0xff] }
 0x1fc   : > { %v1047_v43 = vsel %vm1031_vm1, %v1020_v39, 0.0 }
 0x1fd   : > { %1048 = vadd.xlane.f32.xlu1 %v1047_v43 }
 0x1ff   : > { %1051 = vadd.xlane.f32.xlu0 %v1050_v45 }
 0x201   : > { %1054 = vadd.xlane.f32.xlu1 %v1053_v46 }
 0x202   : > { %v2131_v47 = vpop.f32.mrb[4].mxu1 }
 0x203   : > { %v970_v48 = vadd.f32 %v2131_v47, %v2559_v40  ;;  %v961_v49 = vpop.f32.mrb[5].mxu1 }
 0x204   : > { %v962_v50 = vadd.f32 %v2559_v40, %v961_v49  ;;  %v2132_v51 = vpop.f32.mrb[6].mxu1 }
 0x205   : > { %v973_v53 = vadd.f32 %v2132_v51, %v2559_v40  ;;  %v964_v54 = vpop.f32.mrb[7].mxu1  ;;  %v1002_v55 = vmax.f32 %v970_v48, 0.0 }
 0x206   : > { %v1000_v56 = vmax.f32 %v962_v50, 0.0  ;;  %v965_v57 = vadd.f32 %v2559_v40, %v964_v54  ;;  %v2246_v54 = vld [vmem:[%s2941_s10] sm:$0xff]  }
 0x207   : > { %v1003_v58 = vmax.f32 %v973_v53, 0.0  ;;  %v1025_v0 = vmul.f32 %v2566_v9, %v1002_v55  ;;  %2161 = vmatprep.subr.bf16.mxu1 %v2246_v54 }
 0x208   : > { %v1001_v59 = vmax.f32 %v965_v57, 0.0  ;;  %v1023_v60 = vmul.f32 %v2566_v9, %v1000_v56  ;;  %2162 = vmatpush3.bf16.msra.mxu1 %v2246_v54 }
 0x209   : > { %v1026_v2 = vmul.f32 %v2566_v9, %v1003_v58  ;;  %v1062_v3 = vsel %vm1031_vm1, %v1025_v0, 0.0 }
 0x20a   : > { %v1056_v61 = vsel %vm1031_vm1, %v1023_v60, 0.0  ;;  %v1024_v62 = vmul.f32 %v2566_v9, %v1001_v59 }
 0x20b   : > { %1057 = vadd.xlane.f32.xlu0 %v1056_v61  ;;  %v1065_v4 = vsel %vm1031_vm1, %v1026_v2, 0.0 }
 0x20c   : > { %v1059_v1 = vsel %vm1031_vm1, %v1024_v62, 0.0 }
 0x20d   : > { %1060 = vadd.xlane.f32.xlu1 %v1059_v1 }
 0x20f   : > { %1063 = vadd.xlane.f32.xlu0 %v1062_v3 }
 0x211   : > { %1066 = vadd.xlane.f32.xlu1 %v1065_v4 }
 0x212   : > { %v2135_v5 = vpop.f32.mrb[8].mxu1 }
 0x213   : > { %v986_v52 = vadd.f32 %v2135_v5, %v2559_v40  ;;  %v977_v63 = vpop.f32.mrb[9].mxu1 }
 0x214   : > { %v978_v6 = vadd.f32 %v2559_v40, %v977_v63  ;;  %v2136_v7 = vpop.f32.mrb[10].mxu1 }
 0x215   : > { %v989_v8 = vadd.f32 %v2136_v7, %v2559_v40  ;;  %v980_v10 = vpop.f32.mrb[11].mxu1  ;;  %v1006_v11 = vmax.f32 %v986_v52, 0.0 }
 0x216   : > { %v1004_v12 = vmax.f32 %v978_v6, 0.0  ;;  %v981_v13 = vadd.f32 %v2559_v40, %v980_v10 }
 0x217   : > { %v1007_v14 = vmax.f32 %v989_v8, 0.0  ;;  %v1029_v20 = vmul.f32 %v2566_v9, %v1006_v11 }
 0x218   : > { %v1005_v15 = vmax.f32 %v981_v13, 0.0  ;;  %v1027_v16 = vmul.f32 %v2566_v9, %v1004_v12 }
 0x219   : > { %v1030_v40 = vmul.f32 %v2566_v9, %v1007_v14  ;;  %v1074_v25 = vsel %vm1031_vm1, %v1029_v20, 0.0 }
 0x21a   : > { %v2607_v17 = vpop.f32.mrb[12].mxu1  ;;  %v1068_v18 = vsel %vm1031_vm1, %v1027_v16, 0.0  ;;  %v1028_v19 = vmul.f32 %v2566_v9, %v1005_v15 }
 0x21b   : > { %v2612_v21 = vpop.f32.mrb[13].mxu1  ;;  %1069 = vadd.xlane.f32.xlu0 %v1068_v18  ;;  %v1077_v26 = vsel %vm1031_vm1, %v1030_v40, 0.0 }
 0x21c   : > { %v2614_v22 = vpop.f32.mrb[14].mxu1  ;;  %v1071_v23 = vsel %vm1031_vm1, %v1028_v19, 0.0 }
 0x21d   : > { %v2618_v24 = vpop.f32.mrb[15].mxu1  ;;  %1072 = vadd.xlane.f32.xlu1 %v1071_v23 }
 0x21f   : > { %1075 = vadd.xlane.f32.xlu0 %v1074_v25 }
 0x221   : > { %1078 = vadd.xlane.f32.xlu1 %v1077_v26 }
 0x222   : > { %v2622_v27 = vpop.f32.mrb[16].mxu1 }
 0x223   : > { %v2624_v28 = vpop.f32.mrb[17].mxu1 }
 0x224   : > { %v2626_v29 = vpop.f32.mrb[18].mxu1 }
 0x225   : > { %v2628_v30 = vpop.f32.mrb[19].mxu1 }
 0x22a   : > { %v2630_v31 = vpop.f32.mrb[20].mxu1 }
 0x22b   : > { %v2632_v9 = vpop.f32.mrb[21].mxu1 }
 0x22c   : > { %v2634_v32 = vpop.f32.mrb[22].mxu1 }
 0x22d   : > { %v2636_v33 = vpop.f32.mrb[23].mxu1 }
 0x232   : > { %v2638_v34 = vpop.f32.mrb[24].mxu1 }
 0x233   : > { %v2640_v35 = vpop.f32.mrb[25].mxu1 }
 0x234   : > { %v2642_v36 = vpop.f32.mrb[26].mxu1 }
 0x235   : > { %v2644_v37 = vpop.f32.mrb[27].mxu1 }
 0x277   : > { %v1040_v39 = vpop.xlane.xlu1 %1039 }
 0x278   : > { %v1089_v41 = vadd.f32 %v2646_v38, %v1040_v39  ;;  %v1034_v42 = vpop.xlane.xlu0 %1033 }
 0x279   : > { %v1087_v43 = vadd.f32 %v2646_v38, %v1034_v42  ;;  %v2670_v42 = vld [vmem:[%s2939_s8] ss:$0 sm:$0xff] }
 0x27a   : > { %v1105_v44 = vmax.f32 %v1089_v41, 0.0 }
 0x27b   : > { %v1103_v45 = vmax.f32 %v1087_v43, 0.0  ;;  %v1043_v46 = vpop.xlane.xlu1 %1042 }
 0x27c   : > { %v1090_v47 = vadd.f32 %v2646_v38, %v1043_v46  ;;  %1140 = vperm.xlu1 %2197, %v1105_v44   ;;  %v1037_v48 = vpop.xlane.xlu0 %1036 }
 0x27d   : > { %1130 = vperm.xlu0 %2196, %v1103_v45   ;;  %v1088_v50 = vadd.f32 %v2646_v38, %v1037_v48 }
 0x27e   : > { %v1106_v49 = vmax.f32 %v1090_v47, 0.0  ;;  %v2684_v47 = vld [vmem:[%s2940_s9] ss:$0 sm:$0xff] }
 0x27f   : > { %v1104_v51 = vmax.f32 %v1088_v50, 0.0 }
 0x280   : > { %1145 = vperm.xlu1 %2197, %v1106_v49  }
 0x284   : > { %1135 = vperm.xlu1 %2197, %v1104_v51  }
 0x288   : > { %v1046_v53 = vpop.xlane.xlu0 %1045 }
 0x289   : > { %v1091_v58 = vadd.f32 %v2646_v38, %v1046_v53 }
 0x28a   : > { %v1049_v57 = vpop.xlane.xlu1 %1048 }
 0x28b   : > { %v1107_v60 = vmax.f32 %v1091_v58, 0.0  ;;  %v1092_v61 = vadd.f32 %v2646_v38, %v1049_v57 }
 0x28c   : > { %v1052_v55 = vpop.xlane.xlu0 %1051 }
 0x28d   : > { %v1093_v56 = vadd.f32 %v2646_v38, %v1052_v55  ;;  %v1108_v0 = vmax.f32 %v1092_v61, 0.0 }
 0x28e   : > { %v1055_v62 = vpop.xlane.xlu1 %1054 }
 0x28f   : > { %v1109_v59 = vmax.f32 %v1093_v56, 0.0  ;;  %v1094_v1 = vadd.f32 %v2646_v38, %v1055_v62 }
 0x291   : > { %1160 = vperm.xlu1 %2197, %v1109_v59   ;;  %v1110_v4 = vmax.f32 %v1094_v1, 0.0 }
 0x295   : > { %1150 = vperm.xlu1 %2197, %v1107_v60  }
 0x298   : > { %v1058_v2 = vpop.xlane.xlu0 %1057 }
 0x299   : > { %1155 = vperm.xlu1 %2197, %v1108_v0   ;;  %v1095_v5 = vadd.f32 %v2646_v38, %v1058_v2 }
 0x29a   : > { %v1061_v3 = vpop.xlane.xlu1 %1060 }
 0x29b   : > { %v1096_v52 = vadd.f32 %v2646_v38, %v1061_v3  ;;  %v1111_v8 = vmax.f32 %v1095_v5, 0.0 }
 0x29c   : > { %v1064_v63 = vpop.xlane.xlu0 %1063 }
 0x29d   : > { %v1112_v6 = vmax.f32 %v1096_v52, 0.0  ;;  %1165 = vperm.xlu1 %2197, %v1110_v4   ;;  %v1097_v10 = vadd.f32 %v2646_v38, %v1064_v63 }
 0x29e   : > { %v1067_v7 = vpop.xlane.xlu1 %1066 }
 0x29f   : > { %v1098_v11 = vadd.f32 %v2646_v38, %v1067_v7  ;;  %1175 = vperm.xlu0 %2196, %v1112_v6   ;;  %v1113_v13 = vmax.f32 %v1097_v10, 0.0 }
 0x2a1   : > { %v1114_v12 = vmax.f32 %v1098_v11, 0.0  ;;  %1170 = vperm.xlu1 %2197, %v1111_v8  }
 0x2a3   : > { %1185 = vperm.xlu0 %2196, %v1114_v12  }
 0x2a5   : > { %1180 = vperm.xlu1 %2197, %v1113_v13  }
 0x2a8   : > { %v1070_v14 = vpop.xlane.xlu0 %1069 }
 0x2a9   : > { %v1099_v15 = vadd.f32 %v2646_v38, %v1070_v14 }
 0x2aa   : > { %v1073_v16 = vpop.xlane.xlu1 %1072 }
 0x2ab   : > { %v1115_v18 = vmax.f32 %v1099_v15, 0.0  ;;  %v1100_v19 = vadd.f32 %v2646_v38, %v1073_v16 }
 0x2ac   : > { %v1076_v20 = vpop.xlane.xlu0 %1075 }
 0x2ad   : > { %v1116_v23 = vmax.f32 %v1100_v19, 0.0  ;;  %v1101_v40 = vadd.f32 %v2646_v38, %v1076_v20  ;;  %1190 = vperm.xlu1 %2197, %v1115_v18  }
 0x2ae   : > { %v1079_v25 = vpop.xlane.xlu1 %1078 }
 0x2af   : > { %v1117_v26 = vmax.f32 %v1101_v40, 0.0  ;;  %v1102_v39 = vadd.f32 %v2646_v38, %v1079_v25  ;;  %1195 = vperm.xlu0 %2196, %v1116_v23  }
 0x2b1   : > { %v1118_v41 = vmax.f32 %v1102_v39, 0.0  ;;  %1200 = vperm.xlu1 %2197, %v1117_v26  }
 0x2b3   : > { %1205 = vperm.xlu0 %2196, %v1118_v41  }
 0x2fb   : > { %v2672_v43 = vpop.permute.xlu1 %1140 }
 0x2fc   : > { %v1216_v44 = vmul.f32 %v2670_v42, %v2672_v43  ;;  %v2676_v45 = vpop.permute.xlu0 %1130 }
 0x2fd   : > { %v1214_v38 = vmul.f32 %v2670_v42, %v2676_v45 }
 0x2fe   : > { %v1297_v46 = vadd.f32 %v2607_v17, %v1216_v44 }
 0x2ff   : > { %v2686_v48 = vpop.permute.xlu1 %1145  ;;  %v1289_v51 = vadd.f32 %v2612_v21, %v1214_v38 }
 0x300   : > { %v1217_v49 = vmul.f32 %v2670_v42, %v2686_v48  ;;  %v1360_v50 = vadd.f32 %v2684_v47, %v1297_v46 }
 0x301   : > { %v1358_v57 = vadd.f32 %v2684_v47, %v1289_v51 }
 0x302   : > { %v1300_v53 = vadd.f32 %v2614_v22, %v1217_v49  ;;  %v1376_v56 = vmax.f32 %v1360_v50, 0.0 }
 0x303   : > { %v2693_v17 = vpop.permute.xlu1 %1135  ;;  %v1374_v62 = vmax.f32 %v1358_v57, 0.0 }
 0x304   : > { %v1361_v54 = vadd.f32 %v2684_v47, %v1300_v53  ;;  %v1215_v55 = vmul.f32 %v2670_v42, %v2693_v17 }
 0x306   : > { %v1377_v58 = vmax.f32 %v1361_v54, 0.0  ;;  %v1292_v59 = vadd.f32 %v2618_v24, %v1215_v55 }
 0x308   : > { %v1391_v60 = vpack.c.bf16 %v1377_v58, %v1376_v56  ;;  %v1359_v61 = vadd.f32 %v2684_v47, %v1292_v59 }
 0x30a   : > { %v1375_v21 = vmax.f32 %v1359_v61, 0.0 }
 0x30c   : > { %v1390_v0 = vpack.c.bf16 %v1375_v21, %v1374_v62 }
 0x30e   : > { %2163 = vmatprep.mubr.msk.bf16.mxu1 %vm1031_vm1, %v1390_v0 }
 0x30f   : > { %2164 = vmatmul.mubr.msk.bf16.vlgmr.msra.gmra.mrb[28].mxu1 %vm1031_vm1, %v1391_v60 }
 0x310   : > { %v2703_v22 = vpop.permute.xlu1 %1160 }
 0x311   : > { %v1220_v24 = vmul.f32 %v2670_v42, %v2703_v22 }
 0x313   : > { %v1313_v6 = vadd.f32 %v2622_v27, %v1220_v24 }
 0x314   : > { %v2705_v1 = vpop.permute.xlu1 %1150 }
 0x315   : > { %v1218_v2 = vmul.f32 %v2670_v42, %v2705_v1 }
 0x317   : > { %v1305_v3 = vadd.f32 %v2624_v28, %v1218_v2 }
 0x318   : > { %v2712_v4 = vpop.permute.xlu1 %1155 }
 0x319   : > { %v1219_v5 = vmul.f32 %v2670_v42, %v2712_v4  ;;  %v1362_v52 = vadd.f32 %v2684_v47, %v1305_v3 }
 0x31b   : > { %v1308_v63 = vadd.f32 %v2628_v30, %v1219_v5  ;;  %v1378_v11 = vmax.f32 %v1362_v52, 0.0  ;;  %v1364_v30 = vadd.f32 %v2684_v47, %v1313_v6 }
 0x31c   : > { %v2719_v7 = vpop.permute.xlu1 %1165 }
 0x31d   : > { %v1363_v8 = vadd.f32 %v2684_v47, %v1308_v63  ;;  %v1221_v28 = vmul.f32 %v2670_v42, %v2719_v7  ;;  %v1380_v26 = vmax.f32 %v1364_v30, 0.0 }
 0x31e   : > { %v2724_v10 = vpop.permute.xlu0 %1175 }
 0x31f   : > { %v1379_v12 = vmax.f32 %v1363_v8, 0.0  ;;  %v1316_v13 = vadd.f32 %v2626_v29, %v1221_v28  ;;  %v1223_v14 = vmul.f32 %v2670_v42, %v2724_v10 }
 0x320   : > { %v2730_v15 = vpop.permute.xlu1 %1170 }
 0x321   : > { %v1365_v27 = vadd.f32 %v2684_v47, %v1316_v13  ;;  %v1324_v16 = vadd.f32 %v2636_v33, %v1223_v14  ;;  %v1222_v18 = vmul.f32 %v2670_v42, %v2730_v15  ;;  %v1392_v19 = vpack.c.bf16 %v1379_v12, %v1378_v11  ;;  %v2791_v14 = vld [vmem:[%s2943_s12] ss:$0 sm:$0xff] }
 0x322   : > { %v2736_v20 = vpop.permute.xlu0 %1185 }
 0x323   : > { %v1381_v23 = vmax.f32 %v1365_v27, 0.0  ;;  %v1367_v29 = vadd.f32 %v2684_v47, %v1324_v16  ;;  %v1321_v40 = vadd.f32 %v2632_v9, %v1222_v18  ;;  %v1225_v25 = vmul.f32 %v2670_v42, %v2736_v20  ;;  %2167 = vmatprep.mubr.msk.bf16.mxu1 %vm1031_vm1, %v1392_v19 }
 0x324   : > { %v2743_v39 = vpop.permute.xlu1 %1180 }
 0x325   : > { %v1366_v33 = vadd.f32 %v2684_v47, %v1321_v40  ;;  %v1332_v41 = vadd.f32 %v2634_v32, %v1225_v25  ;;  %v1224_v44 = vmul.f32 %v2670_v42, %v2743_v39  ;;  %v1393_v46 = vpack.c.bf16 %v1381_v23, %v1380_v26 }
 0x326   : > { %v1383_v38 = vmax.f32 %v1367_v29, 0.0 }
 0x327   : > { %v1382_v49 = vmax.f32 %v1366_v33, 0.0  ;;  %v1369_v9 = vadd.f32 %v2684_v47, %v1332_v41  ;;  %v1329_v50 = vadd.f32 %v2630_v31, %v1224_v44  ;;  %2168 = vmatmul.mubr.msk.bf16.gmra.mrb[32].mxu1 %vm1031_vm1, %v1393_v46 }
 0x329   : > { %v1368_v51 = vadd.f32 %v2684_v47, %v1329_v50  ;;  %v1394_v53 = vpack.c.bf16 %v1383_v38, %v1382_v49  ;;  %v1385_v54 = vmax.f32 %v1369_v9, 0.0 }
 0x32b   : > { %v1384_v55 = vmax.f32 %v1368_v51, 0.0  ;;  %2171 = vmatprep.mubr.msk.bf16.mxu1 %vm1031_vm1, %v1394_v53 }
 0x32c   : > { %v2754_v32 = vpop.permute.xlu1 %1190 }
 0x32d   : > { %v1226_v56 = vmul.f32 %v2670_v42, %v2754_v32  ;;  %v1395_v57 = vpack.c.bf16 %v1385_v54, %v1384_v55 }
 0x32e   : > { %v2758_v58 = vpop.permute.xlu0 %1195 }
 0x32f   : > { %v1337_v59 = vadd.f32 %v2640_v35, %v1226_v56  ;;  %v1227_v31 = vmul.f32 %v2670_v42, %v2758_v58  ;;  %2172 = vmatmul.mubr.msk.bf16.gmra.mrb[36].mxu1 %vm1031_vm1, %v1395_v57 }
 0x330   : > { %v2764_v60 = vpop.permute.xlu1 %1200 }
 0x331   : > { %v1370_v61 = vadd.f32 %v2684_v47, %v1337_v59  ;;  %v1340_v62 = vadd.f32 %v2644_v37, %v1227_v31  ;;  %v1228_v21 = vmul.f32 %v2670_v42, %v2764_v60 }
 0x332   : > { %v2770_v0 = vpop.permute.xlu0 %1205 }
 0x333   : > { %v1371_v2 = vadd.f32 %v2684_v47, %v1340_v62  ;;  %v1345_v35 = vadd.f32 %v2638_v34, %v1228_v21  ;;  %v1229_v3 = vmul.f32 %v2670_v42, %v2770_v0  ;;  %v1386_v24 = vmax.f32 %v1370_v61, 0.0  ;;  %v2784_v34 = vld [vmem:[%s2942_s11] ss:$0 sm:$0xff] }
 0x335   : > { %v1387_v5 = vmax.f32 %v1371_v2, 0.0  ;;  %v1372_v52 = vadd.f32 %v2684_v47, %v1345_v35  ;;  %v1348_v63 = vadd.f32 %v2642_v36, %v1229_v3 }
 0x337   : > { %v1373_v37 = vadd.f32 %v2684_v47, %v1348_v63  ;;  %v1396_v6 = vpack.c.bf16 %v1387_v5, %v1386_v24  ;;  %v1388_v8 = vmax.f32 %v1372_v52, 0.0 }
 0x339   : > { %v1389_v28 = vmax.f32 %v1373_v37, 0.0  ;;  %2175 = vmatprep.mubr.msk.bf16.mxu1 %vm1031_vm1, %v1396_v6 }
 0x33b   : > { %v1397_v11 = vpack.c.bf16 %v1389_v28, %v1388_v8 }
 0x33d   : > { %2176 = vmatmul.mubr.msk.bf16.gmra.mrb[40].mxu1 %vm1031_vm1, %v1397_v11 }
 0x3e2   : > { %v2165_v42 = vpop.f32.mrb[28].mxu1 }
 0x3e3   : > { %v1480_v12 = vadd.f32 %v2165_v42, %v2784_v34  ;;  %v1471_v13 = vpop.f32.mrb[29].mxu1 }
 0x3e4   : > { %v1472_v36 = vadd.f32 %v2784_v34, %v1471_v13  ;;  %v2166_v47 = vpop.f32.mrb[30].mxu1 }
 0x3e5   : > { %v1536_v30 = vmax.f32 %v1480_v12, 0.0  ;;  %v1483_v27 = vadd.f32 %v2166_v47, %v2784_v34  ;;  %v1474_v16 = vpop.f32.mrb[31].mxu1 }
 0x3e6   : > { %v1534_v18 = vmax.f32 %v1472_v36, 0.0  ;;  %v1475_v19 = vadd.f32 %v2784_v34, %v1474_v16 }
 0x3e7   : > { %v1537_v23 = vmax.f32 %v1483_v27, 0.0  ;;  %v1559_v29 = vmul.f32 %v2791_v14, %v1536_v30 }
 0x3e8   : > { %v1535_v40 = vmax.f32 %v1475_v19, 0.0  ;;  %v1557_v25 = vmul.f32 %v2791_v14, %v1534_v18 }
 0x3e9   : > { %v1580_v26 = vsel %vm1573_vm2, %v1559_v29, 0.0  ;;  %v1560_v44 = vmul.f32 %v2791_v14, %v1537_v23 }
 0x3ea   : > { %1581 = vadd.xlane.f32.xlu0 %v1580_v26  ;;  %v1574_v33 = vsel %vm1573_vm2, %v1557_v25, 0.0  ;;  %v1558_v41 = vmul.f32 %v2791_v14, %v1535_v40 }
 0x3eb   : > { %1575 = vadd.xlane.f32.xlu1 %v1574_v33  ;;  %v1583_v38 = vsel %vm1573_vm2, %v1560_v44, 0.0 }
 0x3ec   : > { %v1577_v46 = vsel %vm1573_vm2, %v1558_v41, 0.0 }
 0x3ee   : > { %1578 = vadd.xlane.f32.xlu0 %v1577_v46 }
 0x3ef   : > { %1584 = vadd.xlane.f32.xlu1 %v1583_v38 }
 0x3fa   : > { %v2169_v49 = vpop.f32.mrb[32].mxu1 }
 0x3fb   : > { %v1496_v9 = vadd.f32 %v2169_v49, %v2784_v34  ;;  %v1487_v50 = vpop.f32.mrb[33].mxu1 }
 0x3fc   : > { %v1488_v51 = vadd.f32 %v2784_v34, %v1487_v50  ;;  %v2170_v53 = vpop.f32.mrb[34].mxu1 }
 0x3fd   : > { %v1540_v54 = vmax.f32 %v1496_v9, 0.0  ;;  %v1499_v55 = vadd.f32 %v2170_v53, %v2784_v34  ;;  %v1490_v56 = vpop.f32.mrb[35].mxu1 }
 0x3fe   : > { %v1538_v57 = vmax.f32 %v1488_v51, 0.0  ;;  %v1491_v59 = vadd.f32 %v2784_v34, %v1490_v56 }
 0x3ff   : > { %v1541_v31 = vmax.f32 %v1499_v55, 0.0  ;;  %v1563_v61 = vmul.f32 %v2791_v14, %v1540_v54 }
 0x400   : > { %v1539_v62 = vmax.f32 %v1491_v59, 0.0  ;;  %v1561_v35 = vmul.f32 %v2791_v14, %v1538_v57 }
 0x401   : > { %v1592_v21 = vsel %vm1573_vm2, %v1563_v61, 0.0  ;;  %v1564_v2 = vmul.f32 %v2791_v14, %v1541_v31 }
 0x402   : > { %1593 = vadd.xlane.f32.xlu0 %v1592_v21  ;;  %v2173_v3 = vpop.f32.mrb[36].mxu1  ;;  %v1562_v63 = vmul.f32 %v2791_v14, %v1539_v62  ;;  %v1586_v42 = vsel %vm1573_vm2, %v1561_v35, 0.0  ;;  %v2839_v21 = vld [vmem:[#allocation3] ss:$0 sm:$0xff] }
 0x403   : > { %v1512_v24 = vadd.f32 %v2173_v3, %v2784_v34  ;;  %v1503_v5 = vpop.f32.mrb[37].mxu1  ;;  %v1595_v52 = vsel %vm1573_vm2, %v1564_v2, 0.0 }
 0x404   : > { %v1504_v37 = vadd.f32 %v2784_v34, %v1503_v5  ;;  %1596 = vadd.xlane.f32.xlu1 %v1595_v52  ;;  %v2174_v6 = vpop.f32.mrb[38].mxu1  ;;  %v1589_v47 = vsel %vm1573_vm2, %v1562_v63, 0.0 }
 0x405   : > { %v1544_v8 = vmax.f32 %v1512_v24, 0.0  ;;  %v1515_v28 = vadd.f32 %v2174_v6, %v2784_v34  ;;  %v1506_v11 = vpop.f32.mrb[39].mxu1 }
 0x406   : > { %v1542_v12 = vmax.f32 %v1504_v37, 0.0  ;;  %v1507_v13 = vadd.f32 %v2784_v34, %v1506_v11  ;;  %1587 = vadd.xlane.f32.xlu0 %v1586_v42 }
 0x407   : > { %v1545_v36 = vmax.f32 %v1515_v28, 0.0  ;;  %v1567_v30 = vmul.f32 %v2791_v14, %v1544_v8 }
 0x408   : > { %v1543_v27 = vmax.f32 %v1507_v13, 0.0  ;;  %1590 = vadd.xlane.f32.xlu1 %v1589_v47  ;;  %v1565_v19 = vmul.f32 %v2791_v14, %v1542_v12 }
 0x409   : > { %v1604_v16 = vsel %vm1573_vm2, %v1567_v30, 0.0  ;;  %v1568_v18 = vmul.f32 %v2791_v14, %v1545_v36 }
 0x40a   : > { %1605 = vadd.xlane.f32.xlu0 %v1604_v16  ;;  %v1566_v29 = vmul.f32 %v2791_v14, %v1543_v27  ;;  %v1598_v40 = vsel %vm1573_vm2, %v1565_v19, 0.0 }
 0x40b   : > { %v1607_v23 = vsel %vm1573_vm2, %v1568_v18, 0.0 }
 0x40c   : > { %1608 = vadd.xlane.f32.xlu1 %v1607_v23  ;;  %v1601_v25 = vsel %vm1573_vm2, %v1566_v29, 0.0 }
 0x40e   : > { %1599 = vadd.xlane.f32.xlu0 %v1598_v40 }
 0x410   : > { %v2177_v26 = vpop.f32.mrb[40].mxu1  ;;  %1602 = vadd.xlane.f32.xlu1 %v1601_v25 }
 0x411   : > { %v1528_v33 = vadd.f32 %v2177_v26, %v2784_v34  ;;  %v1519_v41 = vpop.f32.mrb[41].mxu1 }
 0x412   : > { %v1520_v44 = vadd.f32 %v2784_v34, %v1519_v41  ;;  %v2178_v46 = vpop.f32.mrb[42].mxu1 }
 0x413   : > { %v1531_v38 = vadd.f32 %v2178_v46, %v2784_v34  ;;  %v1522_v49 = vpop.f32.mrb[43].mxu1  ;;  %v1548_v9 = vmax.f32 %v1528_v33, 0.0 }
 0x414   : > { %v1546_v50 = vmax.f32 %v1520_v44, 0.0  ;;  %v1523_v51 = vadd.f32 %v2784_v34, %v1522_v49 }
 0x415   : > { %v1549_v53 = vmax.f32 %v1531_v38, 0.0  ;;  %v1571_v59 = vmul.f32 %v2791_v14, %v1548_v9 }
 0x416   : > { %v1547_v54 = vmax.f32 %v1523_v51, 0.0  ;;  %v1569_v55 = vmul.f32 %v2791_v14, %v1546_v50 }
 0x417   : > { %v1572_v61 = vmul.f32 %v2791_v14, %v1549_v53  ;;  %v1616_v62 = vsel %vm1573_vm2, %v1571_v59, 0.0 }
 0x418   : > { %v1610_v56 = vsel %vm1573_vm2, %v1569_v55, 0.0  ;;  %v1570_v57 = vmul.f32 %v2791_v14, %v1547_v54 }
 0x419   : > { %1611 = vadd.xlane.f32.xlu0 %v1610_v56  ;;  %v1619_v34 = vsel %vm1573_vm2, %v1572_v61, 0.0 }
 0x41a   : > { %v1613_v31 = vsel %vm1573_vm2, %v1570_v57, 0.0 }
 0x41b   : > { %1614 = vadd.xlane.f32.xlu1 %v1613_v31 }
 0x41d   : > { %1617 = vadd.xlane.f32.xlu0 %v1616_v62 }
 0x41f   : > { %1620 = vadd.xlane.f32.xlu1 %v1619_v34 }
 0x477   : > { %v1582_v2 = vpop.xlane.xlu0 %1581 }
 0x478   : > { %v1631_v35 = vadd.f32 %v2839_v21, %v1582_v2  ;;  %v1576_v3 = vpop.xlane.xlu1 %1575 }
 0x479   : > { %v1629_v24 = vadd.f32 %v2839_v21, %v1576_v3 }
 0x47a   : > { %v1999_v5 = vmul.f32 -1.442695, %v1631_v35 }
 0x47b   : > { %v1997_v52 = vmul.f32 -1.442695, %v1629_v24  ;;  %v1579_v63 = vpop.xlane.xlu0 %1578 }
 0x47c   : > { %2247 = vpow2.f32 %v1999_v5  ;;  %v1630_v14 = vadd.f32 %v2839_v21, %v1579_v63  ;;  %v1585_v37 = vpop.xlane.xlu1 %1584 }
 0x47d   : > { %2249 = vpow2.f32 %v1997_v52  ;;  %v1632_v6 = vadd.f32 %v2839_v21, %v1585_v37 }
 0x47e   : > { %v1998_v8 = vmul.f32 -1.442695, %v1630_v14 }
 0x47f   : > { %v2000_v28 = vmul.f32 -1.442695, %v1632_v6 }
 0x480   : > { %2251 = vpow2.f32 %v1998_v8 }
 0x481   : > { %2253 = vpow2.f32 %v2000_v28 }
 0x486   : > { %v2248_v11 = vpop.eup %2247 }
 0x487   : > { %v2250_v42 = vpop.eup %2249  ;;  %v1695_v12 = vadd.f32 1.0, %v2248_v11 }
 0x488   : > { %v1693_v13 = vadd.f32 1.0, %v2250_v42 }
 0x489   : > { %2255 = vrcp.f32 %v1695_v12 }
 0x48a   : > { %v2252_v36 = vpop.eup %2251  ;;  %2257 = vrcp.f32 %v1693_v13 }
 0x48b   : > { %v2254_v47 = vpop.eup %2253  ;;  %v1694_v30 = vadd.f32 1.0, %v2252_v36 }
 0x48c   : > { %v1696_v27 = vadd.f32 1.0, %v2254_v47 }
 0x48d   : > { %2259 = vrcp.f32 %v1694_v30 }
 0x48e   : > { %2261 = vrcp.f32 %v1696_v27 }
 0x48f   : > { %v1594_v16 = vpop.xlane.xlu0 %1593 }
 0x490   : > { %v1635_v18 = vadd.f32 %v2839_v21, %v1594_v16 }
 0x491   : > { %v1597_v19 = vpop.xlane.xlu1 %1596 }
 0x492   : > { %v2003_v29 = vmul.f32 -1.442695, %v1635_v18  ;;  %v1636_v40 = vadd.f32 %v2839_v21, %v1597_v19 }
 0x493   : > { %v2256_v23 = vpop.eup %2255  ;;  %v1588_v26 = vpop.xlane.xlu0 %1587 }
 0x494   : > { %v2258_v25 = vpop.eup %2257  ;;  %1756 = vperm.xlu1 %2197, %v2256_v23   ;;  %2263 = vpow2.f32 %v2003_v29  ;;  %v2004_v33 = vmul.f32 -1.442695, %v1636_v40  ;;  %v1633_v41 = vadd.f32 %v2839_v21, %v1588_v26 }
 0x495   : > { %1746 = vperm.xlu0 %2196, %v2258_v25   ;;  %v1591_v44 = vpop.xlane.xlu1 %1590 }
 0x496   : > { %2265 = vpow2.f32 %v2004_v33  ;;  %v2001_v38 = vmul.f32 -1.442695, %v1633_v41  ;;  %v1634_v49 = vadd.f32 %v2839_v21, %v1591_v44 }
 0x497   : > { %v2260_v46 = vpop.eup %2259  ;;  %v1606_v50 = vpop.xlane.xlu0 %1605 }
 0x498   : > { %v2262_v9 = vpop.eup %2261  ;;  %1751 = vperm.xlu1 %2197, %v2260_v46   ;;  %2267 = vpow2.f32 %v2001_v38  ;;  %v2002_v51 = vmul.f32 -1.442695, %v1634_v49  ;;  %v1639_v53 = vadd.f32 %v2839_v21, %v1606_v50 }
 0x499   : > { %1761 = vperm.xlu0 %2196, %v2262_v9   ;;  %v1609_v54 = vpop.xlane.xlu1 %1608 }
 0x49a   : > { %2269 = vpow2.f32 %v2002_v51  ;;  %v2007_v55 = vmul.f32 -1.442695, %v1639_v53  ;;  %v1640_v56 = vadd.f32 %v2839_v21, %v1609_v54 }
 0x49b   : > { %v1600_v57 = vpop.xlane.xlu0 %1599 }
 0x49c   : > { %2271 = vpow2.f32 %v2007_v55  ;;  %v2008_v59 = vmul.f32 -1.442695, %v1640_v56  ;;  %v1637_v31 = vadd.f32 %v2839_v21, %v1600_v57 }
 0x49d   : > { %v1603_v61 = vpop.xlane.xlu1 %1602 }
 0x49e   : > { %v2264_v62 = vpop.eup %2263  ;;  %2273 = vpow2.f32 %v2008_v59  ;;  %v2005_v34 = vmul.f32 -1.442695, %v1637_v31  ;;  %v1638_v2 = vadd.f32 %v2839_v21, %v1603_v61 }
 0x49f   : > { %v1699_v35 = vadd.f32 1.0, %v2264_v62 }
 0x4a0   : > { %v2266_v3 = vpop.eup %2265  ;;  %2275 = vpow2.f32 %v2005_v34  ;;  %v2006_v24 = vmul.f32 -1.442695, %v1638_v2 }
 0x4a1   : > { %2277 = vrcp.f32 %v1699_v35  ;;  %v1700_v5 = vadd.f32 1.0, %v2266_v3  ;;  %v1741_v35 = vlaneseq }
 0x4a2   : > { %v2268_v52 = vpop.eup %2267  ;;  %2279 = vpow2.f32 %v2006_v24 }
 0x4a3   : > { %2281 = vrcp.f32 %v1700_v5  ;;  %v1697_v63 = vadd.f32 1.0, %v2268_v52  ;;  %v1742_v3 = vand.u32 127, %v1741_v35 }
 0x4a4   : > { %v2270_v14 = vpop.eup %2269 }
 0x4a5   : > { %2283 = vrcp.f32 %v1697_v63  ;;  %v1698_v37 = vadd.f32 1.0, %v2270_v14  ;;  %vm1743_vm3 = vcmp.eq.s32.totalorder %v1742_v3, 0 }
 0x4a6   : > { %v1612_v6 = vpop.xlane.xlu0 %1611  ;;  %v2272_v8 = vpop.eup %2271 }
 0x4a7   : > { %v1641_v28 = vadd.f32 %v2839_v21, %v1612_v6  ;;  %2285 = vrcp.f32 %v1698_v37  ;;  %v1703_v11 = vadd.f32 1.0, %v2272_v8 }
 0x4a8   : > { %v1615_v42 = vpop.xlane.xlu1 %1614  ;;  %v2274_v12 = vpop.eup %2273 }
 0x4a9   : > { %v2009_v13 = vmul.f32 -1.442695, %v1641_v28  ;;  %v1642_v36 = vadd.f32 %v2839_v21, %v1615_v42  ;;  %2287 = vrcp.f32 %v1703_v11  ;;  %v1704_v47 = vadd.f32 1.0, %v2274_v12 }
 0x4aa   : > { %v1618_v30 = vpop.xlane.xlu0 %1617  ;;  %v2276_v27 = vpop.eup %2275 }
 0x4ab   : > { %2289 = vpow2.f32 %v2009_v13  ;;  %v2010_v16 = vmul.f32 -1.442695, %v1642_v36  ;;  %v1643_v18 = vadd.f32 %v2839_v21, %v1618_v30  ;;  %v2278_v19 = vpop.eup %2277  ;;  %v1701_v23 = vadd.f32 1.0, %v2276_v27 }
 0x4ac   : > { %2291 = vrcp.f32 %v1704_v47  ;;  %v1621_v29 = vpop.xlane.xlu1 %1620  ;;  %v2280_v40 = vpop.eup %2279  ;;  %1776 = vperm.xlu1 %2197, %v2278_v19  }
 0x4ad   : > { %2293 = vpow2.f32 %v2010_v16  ;;  %v2011_v25 = vmul.f32 -1.442695, %v1643_v18  ;;  %v1644_v26 = vadd.f32 %v2839_v21, %v1621_v29  ;;  %v2282_v33 = vpop.eup %2281  ;;  %v1702_v41 = vadd.f32 1.0, %v2280_v40 }
 0x4ae   : > { %2295 = vrcp.f32 %v1701_v23  ;;  %1781 = vperm.xlu0 %2196, %v2282_v33  }
 0x4af   : > { %2297 = vpow2.f32 %v2011_v25  ;;  %v2012_v44 = vmul.f32 -1.442695, %v1644_v26  ;;  %v2284_v46 = vpop.eup %2283 }
 0x4b0   : > { %2299 = vrcp.f32 %v1702_v41  ;;  %1766 = vperm.xlu1 %2197, %v2284_v46  }
 0x4b1   : > { %2301 = vpow2.f32 %v2012_v44  ;;  %v2286_v38 = vpop.eup %2285 }
 0x4b2   : > { %1771 = vperm.xlu0 %2196, %v2286_v38  }
 0x4b3   : > { %v2288_v49 = vpop.eup %2287 }
 0x4b4   : > { %1796 = vperm.xlu1 %2197, %v2288_v49  }
 0x4b5   : > { %v2290_v9 = vpop.eup %2289 }
 0x4b6   : > { %v2292_v50 = vpop.eup %2291  ;;  %v1705_v51 = vadd.f32 1.0, %v2290_v9 }
 0x4b7   : > { %v2294_v53 = vpop.eup %2293  ;;  %1801 = vperm.xlu0 %2196, %v2292_v50  }
 0x4b8   : > { %v2296_v21 = vpop.eup %2295  ;;  %2303 = vrcp.f32 %v1705_v51  ;;  %v1706_v54 = vadd.f32 1.0, %v2294_v53 }
 0x4b9   : > { %v2298_v55 = vpop.eup %2297  ;;  %1786 = vperm.xlu1 %2197, %v2296_v21  }
 0x4ba   : > { %v2300_v56 = vpop.eup %2299  ;;  %2305 = vrcp.f32 %v1706_v54  ;;  %v1707_v57 = vadd.f32 1.0, %v2298_v55 }
 0x4bb   : > { %v2302_v59 = vpop.eup %2301  ;;  %1791 = vperm.xlu0 %2196, %v2300_v56  }
 0x4bc   : > { %2307 = vrcp.f32 %v1707_v57  ;;  %v1708_v31 = vadd.f32 1.0, %v2302_v59 }
 0x4be   : > { %2309 = vrcp.f32 %v1708_v31 }
 0x4c2   : > { %v2304_v61 = vpop.eup %2303 }
 0x4c3   : > { %1806 = vperm.xlu1 %2197, %v2304_v61  }
 0x4c4   : > { %v2306_v62 = vpop.eup %2305 }
 0x4c5   : > { %1811 = vperm.xlu0 %2196, %v2306_v62  }
 0x4c6   : > { %v2308_v34 = vpop.eup %2307 }
 0x4c7   : > { %1816 = vperm.xlu1 %2197, %v2308_v34  }
 0x4c8   : > { %v2310_v2 = vpop.eup %2309 }
 0x4c9   : > { %1821 = vperm.xlu0 %2196, %v2310_v2  }
 0x513   : > { %v1757_v24 = vpop.permute.xlu1 %1756 }
 0x514   : > { %v1826_v5 = vsel %vm1743_vm3, %v1757_v24, %v2672_v43  ;;  %v1747_v52 = vpop.permute.xlu0 %1746 }
 0x515   : > { %1843 = vst.msk [vmem:[%s2862_s28 + $0x10] sm:$0xff] %vm1840_vm4, %v1826_v5  ;;  %v1824_v63 = vsel %vm1743_vm3, %v1747_v52, %v2676_v45 }
 0x516   : > { %1841 = vst.msk [vmem:[%s2862_s28] sm:$0xff] %vm1840_vm4, %v1824_v63 }
 0x517   : > { %v1752_v14 = vpop.permute.xlu1 %1751 }
 0x518   : > { %v1825_v37 = vsel %vm1743_vm3, %v1752_v14, %v2693_v17  ;;  %v1762_v6 = vpop.permute.xlu0 %1761 }
 0x519   : > { %1842 = vst.msk [vmem:[%s2862_s28 + $0x8] sm:$0xff] %vm1840_vm4, %v1825_v37  ;;  %v1827_v43 = vsel %vm1743_vm3, %v1762_v6, %v2686_v48 }
 0x51a   : > { %1844 = vst.msk [vmem:[%s2862_s28 + $0x18] sm:$0xff] %vm1840_vm4, %v1827_v43 }
 0x52b   : > { %v1777_v8 = vpop.permute.xlu1 %1776 }
 0x52c   : > { %v1830_v45 = vsel %vm1743_vm3, %v1777_v8, %v2703_v22 }
 0x52d   : > { %1847 = vst.msk [vmem:[%s2862_s28 + $0x30] sm:$0xff] %vm1840_vm4, %v1830_v45  ;;  %v1782_v28 = vpop.permute.xlu0 %1781 }
 0x52e   : > { %v1831_v17 = vsel %vm1743_vm3, %v1782_v28, %v2719_v7 }
 0x52f   : > { %1848 = vst.msk [vmem:[%s2862_s28 + $0x38] sm:$0xff] %vm1840_vm4, %v1831_v17  ;;  %v1767_v11 = vpop.permute.xlu1 %1766 }
 0x530   : > { %v1828_v48 = vsel %vm1743_vm3, %v1767_v11, %v2705_v1 }
 0x531   : > { %1845 = vst.msk [vmem:[%s2862_s28 + $0x20] sm:$0xff] %vm1840_vm4, %v1828_v48  ;;  %v1772_v42 = vpop.permute.xlu0 %1771 }
 0x532   : > { %v1829_v22 = vsel %vm1743_vm3, %v1772_v42, %v2712_v4 }
 0x533   : > { %1846 = vst.msk [vmem:[%s2862_s28 + $0x28] sm:$0xff] %vm1840_vm4, %v1829_v22  ;;  %v1797_v12 = vpop.permute.xlu1 %1796 }
 0x534   : > { %v1834_v7 = vsel %vm1743_vm3, %v1797_v12, %v2743_v39 }
 0x535   : > { %1851 = vst.msk [vmem:[%s2862_s28 + $0x50] sm:$0xff] %vm1840_vm4, %v1834_v7 }
 0x536   : > { %v1802_v13 = vpop.permute.xlu0 %1801 }
 0x537   : > { %v1835_v1 = vsel %vm1743_vm3, %v1802_v13, %v2736_v20 }
 0x538   : > { %1852 = vst.msk [vmem:[%s2862_s28 + $0x58] sm:$0xff] %vm1840_vm4, %v1835_v1  ;;  %v1787_v36 = vpop.permute.xlu1 %1786 }
 0x539   : > { %v1832_v4 = vsel %vm1743_vm3, %v1787_v36, %v2730_v15 }
 0x53a   : > { %1849 = vst.msk [vmem:[%s2862_s28 + $0x40] sm:$0xff] %vm1840_vm4, %v1832_v4  ;;  %v1792_v47 = vpop.permute.xlu0 %1791 }
 0x53b   : > { %v1833_v39 = vsel %vm1743_vm3, %v1792_v47, %v2724_v10 }
 0x53c   : > { %1850 = vst.msk [vmem:[%s2862_s28 + $0x48] sm:$0xff] %vm1840_vm4, %v1833_v39 }
 0x542   : > { %v1807_v30 = vpop.permute.xlu1 %1806 }
 0x543   : > { %v1836_v20 = vsel %vm1743_vm3, %v1807_v30, %v2754_v32 }
 0x544   : > { %1853 = vst.msk [vmem:[%s2862_s28 + $0x60] sm:$0xff] %vm1840_vm4, %v1836_v20  ;;  %v1812_v27 = vpop.permute.xlu0 %1811 }
 0x545   : > { %v1837_v16 = vsel %vm1743_vm3, %v1812_v27, %v2758_v58 }
 0x546   : > { %1854 = vst.msk [vmem:[%s2862_s28 + $0x68] sm:$0xff] %vm1840_vm4, %v1837_v16  ;;  %v1817_v15 = vpop.permute.xlu1 %1816 }
 0x547   : > { %v1838_v18 = vsel %vm1743_vm3, %v1817_v15, %v2764_v60 }
 0x548   : > { %1855 = vst.msk [vmem:[%s2862_s28 + $0x70] sm:$0xff] %vm1840_vm4, %v1838_v18  ;;  %v1822_v10 = vpop.permute.xlu0 %1821 }
 0x549   : > { %v1839_v19 = vsel %vm1743_vm3, %v1822_v10, %v2770_v0 }
 0x54a   : > { %1856 = vst.msk [vmem:[%s2862_s28 + $0x78] sm:$0xff] %vm1840_vm4, %v1839_v19 }
 0x54b PF: > { %s28_s17 = sadd.s32 1, %s2317_s17  }
 0x54c   : > { %p25_p4 = scmp.ge.s32.totalorder %s28_s17, 4  }
 0x54e   :  { %27 = sbr.rel (!%p25_p4) target bundleno = 3 (0x3), region = 106 }

</bundles_post_ra>
